<compile_context>
chip_gen: v7x
topology: tpu7x:2x2x1
jax: 0.10.0
libtpu: 0.0.40
codegen_flags: <defaults>
</compile_context>

<pallas_src>
import numpy as np
import jax
import jax.numpy as jnp
from jax import lax
from jax.experimental import pallas as pl
from jax.experimental.pallas import tpu as pltpu

# ----------------------------- module configuration --------------------------
NUM_MELS = 8
REF_ENC_FILTERS = [8, 8, 16]          # 3 conv layers
REF_ENC_SIZE = 3                      # conv kernel size
REF_ENC_STRIDES = [2, 2]              # total time downsampling = 4
REF_ENC_GRU_SIZE = 16

_K = REF_ENC_SIZE
_PAD = REF_ENC_SIZE // 2
_STRIDES = tuple([1] + REF_ENC_STRIDES)          # per-layer conv stride: (1, 2, 2)


def _align8(n):
    return ((n + 7) // 8) * 8


def _conv_slab_layout(bb):
    """Row layout of the packed conv-parameter slab for a block of `bb` sequences."""
    filters = [NUM_MELS] + REF_ENC_FILTERS
    width = bb * max(REF_ENC_FILTERS)
    off, layout = 0, {}
    for i in range(len(REF_ENC_FILTERS)):
        cin = filters[i] + (2 if i == 0 else 0)      # CoordConv1d(with_r=True) appends xx, rr
        cout = filters[i + 1]
        layout[f"w{i}"] = (off, _K * bb * cin, bb * cout)
        off = _align8(off + _K * bb * cin)
        layout[f"p{i}"] = (off, 3, bb * cout)        # rows = (bias, gamma, beta), tiled per batch
        off = _align8(off + 3)
    return layout, _align8(off), width


def _gru_slab_layout(bb):
    h = REF_ENC_GRU_SIZE
    width = 3 * bb * h
    off, layout = 0, {}
    layout["wih"] = (off, bb * REF_ENC_FILTERS[-1], width)
    off = _align8(off + bb * REF_ENC_FILTERS[-1])
    layout["whh"] = (off, bb * h, width)
    off = _align8(off + bb * h)
    layout["b"] = (off, 2, width)                    # rows = (b_ih, b_hh), gate-major, tiled
    off = _align8(off + 2)
    return layout, off, width


# --------------------------------- parameters ---------------------------------
def init_params(key):
    """Torch-layout parameters (Conv1d [Cout, Cin, k]; GRU [3H, in], gate order r,z,n)."""
    def nrm(k, shape, scale=0.1):
        return scale * jax.random.normal(k, shape, jnp.float32)

    keys = iter(jax.random.split(key, 32))
    filters = [NUM_MELS] + REF_ENC_FILTERS
    convs = []
    for i in range(len(REF_ENC_FILTERS)):
        cin = filters[i] + (2 if i == 0 else 0)
        cout = filters[i + 1]
        convs.append(dict(w=nrm(next(keys), (cout, cin, REF_ENC_SIZE)),
                          b=nrm(next(keys), (cout,)),
                          gamma=1.0 + nrm(next(keys), (cout,)),
                          beta=nrm(next(keys), (cout,))))
    h = REF_ENC_GRU_SIZE
    gru = dict(w_ih=nrm(next(keys), (3 * h, REF_ENC_FILTERS[-1])),
               b_ih=nrm(next(keys), (3 * h,)),
               w_hh=nrm(next(keys), (3 * h, h)),
               b_hh=nrm(next(keys), (3 * h,)))
    return dict(convs=convs, gru=gru)


def prepare_params(params, block_batch=8):
    """One-time repack (hoisted out of forward): block-diagonal (per-batch) weights for the
    batch-in-lanes layout, coalesced into two f32 slabs. block_batch is baked into the slabs."""
    bb = int(block_batch)
    h = REF_ENC_GRU_SIZE
    eye = jnp.eye(bb, dtype=jnp.float32)

    c_layout, c_rows, c_width = _conv_slab_layout(bb)
    cslab = jnp.zeros((c_rows, c_width), jnp.float32)
    for i, layer in enumerate(params["convs"]):
        w = layer["w"].astype(jnp.float32)                                    # [Cout, Cin, k]
        wbig = jnp.concatenate(
            [jnp.kron(eye, jnp.transpose(w[:, :, t])) for t in range(_K)], axis=0)
        r0, nr, nc = c_layout[f"w{i}"]
        cslab = cslab.at[r0:r0 + nr, :nc].set(wbig)
        prow = jnp.stack([jnp.tile(layer["b"].astype(jnp.float32), bb),
                          jnp.tile(layer["gamma"].astype(jnp.float32), bb),
                          jnp.tile(layer["beta"].astype(jnp.float32), bb)], axis=0)
        r0, nr, nc = c_layout[f"p{i}"]
        cslab = cslab.at[r0:r0 + nr, :nc].set(prow)

    g_layout, g_rows, g_width = _gru_slab_layout(bb)
    gru = params["gru"]

    def gate_major(w_t):      # torch [3H, in] -> block-diag [bb*in, 3*bb*H], gate-major columns
        return jnp.concatenate(
            [jnp.kron(eye, jnp.transpose(w_t[g * h:(g + 1) * h, :])) for g in range(3)], axis=1)

    def gate_major_bias(b):
        return jnp.concatenate([jnp.tile(b[g * h:(g + 1) * h], bb) for g in range(3)], axis=0)

    gslab = jnp.zeros((g_rows, g_width), jnp.float32)
    r0, nr, _ = g_layout["wih"]
    gslab = gslab.at[r0:r0 + nr, :].set(gate_major(gru["w_ih"].astype(jnp.float32)))
    r0, nr, _ = g_layout["whh"]
    gslab = gslab.at[r0:r0 + nr, :].set(gate_major(gru["w_hh"].astype(jnp.float32)))
    r0, nr, _ = g_layout["b"]
    brow = jnp.stack([gate_major_bias(gru["b_ih"].astype(jnp.float32)),
                      gate_major_bias(gru["b_hh"].astype(jnp.float32))], axis=0)
    gslab = gslab.at[r0:r0 + nr, :].set(brow)

    # TODO(synk): optionally cast the slabs to bf16 (keep f32 accumulate) once tolerances are validated.
    return dict(conv_slab=cslab, gru_slab=gslab)


# ----------------------------------- forward ----------------------------------
def reference_encoder(kparams, mels, mel_lens):
    """mels: [B, n_mels, T] (NCL, like torch); mel_lens: [B] int with max(mel_lens) == T.
    Returns (outputs [B, T2, H], memory [1, B, H], mel_masks [B, T2])."""
    B, n_mels, T = mels.shape
    c0 = n_mels + 2
    hg = REF_ENC_GRU_SIZE

    cslab = kparams["conv_slab"]
    gslab = kparams["gru_slab"]
    bb = gslab.shape[1] // (3 * hg)                   # static block-batch baked into the slabs
    nblk = -(-B // bb)
    b_pad = nblk * bb

    c_layout, _, _ = _conv_slab_layout(bb)
    g_layout, _, _ = _gru_slab_layout(bb)

    # static per-layer conv output lengths
    lsz = [T]
    for s in REF_ENC_STRIDES:
        lsz.append((lsz[-1] - REF_ENC_SIZE + 2 * _PAD) // s + 1)
    t2 = lsz[-1]
    gate = bb * hg

    # ---- XLA glue: mask padded frames, NCL->NLC, CoordConv(with_r) channels ----
    ids = jnp.arange(T)[None, :]
    pad_mask = ids >= mel_lens[:, None]                               # True = padding
    x = jnp.where(pad_mask[:, None, :], 0.0, mels.astype(jnp.float32))
    x = jnp.transpose(x, (0, 2, 1))                                   # [B, T, n_mels]
    # TODO(synk): CoordConv xx channel divides by (T - 1); T == 1 unsupported (same as torch).
    xx = (jnp.arange(T, dtype=jnp.float32) / (T - 1)) * 2.0 - 1.0
    rr = jnp.abs(xx - 0.5)                                            # AddCoords: sqrt((xx-0.5)^2)
    coords = jnp.broadcast_to(jnp.stack([xx, rr], axis=-1)[None], (B, T, 2))
    x0 = jnp.concatenate([x, coords], axis=-1)                        # [B, T, c0]

    ml = mel_lens.astype(jnp.int32)
    for _ in range(2):
        ml = (ml + 1) // 2                                            # stride_lens (ceil) twice

    if b_pad > B:
        x0 = jnp.concatenate([x0, jnp.zeros((b_pad - B, T, c0), jnp.float32)], axis=0)
        ml_pad = jnp.concatenate([ml, jnp.zeros((b_pad - B,), jnp.int32)], axis=0)
    else:
        ml_pad = ml

    # batch-in-lanes packing: lane = (local batch)*channels + channel
    xb = x0.reshape(nblk, bb, T, c0).transpose(0, 2, 1, 3).reshape(nblk, T, bb * c0)
    len2b = jnp.repeat(ml_pad.astype(jnp.float32), hg).reshape(nblk, 1, gate)

    # stride-2 row-selection constants, baked at trace time with numpy (never built in-kernel)
    def sel(l_out, l_in):
        m = np.zeros((l_out, l_in), np.float32)
        m[np.arange(l_out), 2 * np.arange(l_out)] = 1.0
        return jnp.asarray(m)
    s1 = sel(lsz[1], lsz[0])
    s2 = sel(lsz[2], lsz[1])

    def kernel(x_ref, len2_ref, cw_ref, gw_ref, s1_ref, s2_ref, out_ref):
        s_mats = (None, s1_ref, s2_ref)
        h = x_ref[...]                                                # [T, bb*c0]

        # ---------------- conv stack: one im2col matmul per layer ----------------
        for li in range(len(REF_ENC_FILTERS)):
            r0, nr, nc = c_layout[f"w{li}"]
            wbig = cw_ref[r0:r0 + nr, 0:nc]                           # block-diag per-batch weight
            r0p, _, ncp = c_layout[f"p{li}"]
            prow = cw_ref[r0p:r0p + 3, 0:ncp]                         # (bias, gamma, beta) rows
            l_in, w_in = h.shape
            zrow = jnp.zeros((1, w_in), jnp.float32)
            xl = jnp.concatenate([zrow, h[:l_in - 1, :]], axis=0)     # tap 0: x[t-1] (zero pad)
            xr = jnp.concatenate([h[1:, :], zrow], axis=0)            # tap 2: x[t+1] (zero pad)
            patches = jnp.concatenate([xl, h, xr], axis=1)            # [L, k*bb*Cin]
            if _STRIDES[li] == 2:                                     # keep even time rows
                patches = jnp.dot(s_mats[li][...], patches,
                                  preferred_element_type=jnp.float32)
            y = jnp.dot(patches, wbig, preferred_element_type=jnp.float32)
            y = y + prow[0:1, :]
            y = jnp.where(y >= 0.0, y, 0.3 * y)                       # leaky_relu(0.3)
            # InstanceNorm1d(affine): each lane is one (batch, channel); stats over time (unmasked,
            # like torch), biased var, eps=1e-5.
            mean = jnp.mean(y, axis=0, keepdims=True)
            var = jnp.mean(jnp.square(y - mean), axis=0, keepdims=True)
            y = (y - mean) * lax.rsqrt(var + 1e-5)
            h = y * prow[1:2, :] + prow[2:3, :]                       # [l_out, bb*Cout]

        # ------------- GRU (batch_first, packed-sequence semantics) -------------
        r0, nr, _ = g_layout["wih"]
        wih = gw_ref[r0:r0 + nr, :]
        r0, nr, _ = g_layout["whh"]
        whh = gw_ref[r0:r0 + nr, :]
        r0, _, _ = g_layout["b"]
        bih = gw_ref[r0:r0 + 1, :]
        bhh = gw_ref[r0 + 1:r0 + 2, :]
        len2 = len2_ref[...]                                          # [1, bb*H] strided lengths

        gx = jnp.dot(h, wih, preferred_element_type=jnp.float32) + bih       # [t2, 3*bb*H]
        hstate = jnp.zeros((1, gate), jnp.float32)
        for t in range(t2):                                           # t2 is tiny: fully unrolled
            gxt = gx[t:t + 1, :]
            gh = jnp.dot(hstate, whh, preferred_element_type=jnp.float32) + bhh
            r = jax.nn.sigmoid(gxt[:, 0:gate] + gh[:, 0:gate])
            z = jax.nn.sigmoid(gxt[:, gate:2 * gate] + gh[:, gate:2 * gate])
            n = jnp.tanh(gxt[:, 2 * gate:] + r * gh[:, 2 * gate:])
            h_new = (1.0 - z) * n + z * hstate
            valid = len2 > float(t)                                   # freeze past each length
            hstate = jnp.where(valid, h_new, hstate)
            out_ref[t:t + 1, :] = jnp.where(valid, h_new, 0.0)        # pad_packed: zeros past len
        out_ref[t2:t2 + 1, :] = hstate                                # h_n at last valid step

    grid_spec = pltpu.PrefetchScalarGridSpec(
        num_scalar_prefetch=0,
        grid=(nblk,),                                  # batch blocks; 'parallel' for v7x megacore
        in_specs=[
            pl.BlockSpec((None, T, bb * c0), lambda i: (i, 0, 0)),
            pl.BlockSpec((None, 1, gate), lambda i: (i, 0, 0)),
            pl.BlockSpec(cslab.shape, lambda i: (0, 0)),
            pl.BlockSpec(gslab.shape, lambda i: (0, 0)),
            pl.BlockSpec(s1.shape, lambda i: (0, 0)),
            pl.BlockSpec(s2.shape, lambda i: (0, 0)),
        ],
        out_specs=pl.BlockSpec((None, t2 + 1, gate), lambda i: (i, 0, 0)),
    )

    f0, f1, f2 = REF_ENC_FILTERS
    flops = 2 * nblk * (
        lsz[0] * (_K * bb * c0) * (bb * f0)
        + lsz[1] * lsz[0] * (_K * bb * f0)
        + lsz[1] * (_K * bb * f0) * (bb * f1)
        + lsz[2] * lsz[1] * (_K * bb * f1)
        + lsz[2] * (_K * bb * f1) * (bb * f2)
        + t2 * (bb * f2) * (3 * gate)
        + t2 * gate * (3 * gate))
    cost = pl.CostEstimate(
        flops=int(flops),
        transcendentals=int(nblk * t2 * 3 * gate),
        bytes_accessed=int(4 * (xb.size + len2b.size + cslab.size + gslab.size
                                + s1.size + s2.size + nblk * (t2 + 1) * gate)))

    out_slab = pl.pallas_call(
        kernel,
        out_shape=jax.ShapeDtypeStruct((nblk, t2 + 1, gate), jnp.float32),
        grid_spec=grid_spec,
        compiler_params=pltpu.CompilerParams(dimension_semantics=("parallel",)),
        cost_estimate=cost,
    )(xb, len2b, cslab, gslab, s1, s2)

    # ---- XLA epilogue: unpack lanes back to torch layouts ----
    slab = out_slab.reshape(nblk, t2 + 1, bb, hg).transpose(0, 2, 1, 3).reshape(b_pad, t2 + 1, hg)
    outputs = slab[:B, :t2, :]                                        # [B, T2, H]
    memory = slab[:B, t2, :][None, :, :]                              # [1, B, H]
    mel_masks = jnp.arange(t2)[None, :] >= ml[:, None]                # [B, T2] bool
    return outputs, memory, mel_masks


# ------------------------------------ main -------------------------------------
if __name__ == "__main__":
    key = jax.random.PRNGKey(0)
    kp_key, km_key = jax.random.split(key, 2)
    # block_batch=2 keeps the demo grid >= 2 (megacore-friendly); use 8 for larger batches.
    kparams = prepare_params(init_params(kp_key), block_batch=2)

    B, T = 5, 16
    mels = jax.random.normal(km_key, (B, NUM_MELS, T), jnp.float32)   # [N, n_mels, Ty]
    mel_lens = jnp.array([16, 13, 9, 16, 5], jnp.int32)               # torch requires max == T

    fwd = jax.jit(reference_encoder)
    out, memory, mel_masks = fwd(kparams, mels, mel_lens)
    out = jax.block_until_ready(out)
    memory = jax.block_until_ready(memory)
    mel_masks = jax.block_until_ready(mel_masks)

    t2 = T
    for s in REF_ENC_STRIDES:
        t2 = (t2 - REF_ENC_SIZE + 2 * _PAD) // s + 1
    assert out.shape == (B, t2, REF_ENC_GRU_SIZE), out.shape
    assert memory.shape == (1, B, REF_ENC_GRU_SIZE), memory.shape
    assert mel_masks.shape == (B, t2), mel_masks.shape
    assert bool(jnp.all(jnp.isfinite(out))) and bool(jnp.all(jnp.isfinite(memory)))
    # packed-sequence semantics: outputs past each strided length are exactly zero,
    # and memory equals the output at each sequence's last valid step.
    assert bool(jnp.all(jnp.where(mel_masks[:, :, None], out, 0.0) == 0.0))
    ml2 = (mel_lens + 1) // 2
    ml2 = (ml2 + 1) // 2
    last = out[jnp.arange(B), ml2 - 1, :]
    assert bool(jnp.all(last == memory[0])), "memory != last valid GRU state"
    print("KERNEL_OK")
</pallas_src>

<mosaic_0001>
module attributes {stable_mosaic.version = 11 : i64} {
  func.func @kernel(%arg0: i32, %arg1: memref<1x16x20xf32, #tpu.memory_space<vmem>>, %arg2: memref<1x1x32xf32, #tpu.memory_space<vmem>>, %arg3: memref<184x32xf32, #tpu.memory_space<vmem>>, %arg4: memref<72x96xf32, #tpu.memory_space<vmem>>, %arg5: memref<8x16xf32, #tpu.memory_space<vmem>>, %arg6: memref<4x8xf32, #tpu.memory_space<vmem>>, %arg7: memref<1x5x32xf32, #tpu.memory_space<vmem>>) attributes {dimension_semantics = [#tpu.dimension_semantics<parallel>], iteration_bounds = array<i64: 3>, scalar_prefetch = 0 : i64, scratch_operands = 0 : i64, tpu.core_type = #tpu.core_type<tc>, window_params = [{transform_indices = @transform_0, window_bounds = array<i64: 1, 16, 20>}, {transform_indices = @transform_1, window_bounds = array<i64: 1, 1, 32>}, {pipeline_mode = #tpu.pipeline_mode<synchronous>, transform_indices = @transform_2, window_bounds = array<i64: 184, 32>}, {pipeline_mode = #tpu.pipeline_mode<synchronous>, transform_indices = @transform_3, window_bounds = array<i64: 72, 96>}, {pipeline_mode = #tpu.pipeline_mode<synchronous>, transform_indices = @transform_4, window_bounds = array<i64: 8, 16>}, {pipeline_mode = #tpu.pipeline_mode<synchronous>, transform_indices = @transform_5, window_bounds = array<i64: 4, 8>}, {transform_indices = @transform_6, window_bounds = array<i64: 1, 5, 32>}]} {
    %c0 = arith.constant 0 : index
    %c0_0 = arith.constant 0 : index
    %c0_1 = arith.constant 0 : index
    %0 = vector.load %arg1[%c0, %c0_0, %c0_1] : memref<1x16x20xf32, #tpu.memory_space<vmem>>, vector<1x16x20xf32>
    %1 = vector.shape_cast %0 : vector<1x16x20xf32> to vector<16x20xf32>
    %c0_2 = arith.constant 0 : index
    %c0_3 = arith.constant 0 : index
    %2 = vector.load %arg3[%c0_2, %c0_3] : memref<184x32xf32, #tpu.memory_space<vmem>>, vector<60x16xf32>
    %c64 = arith.constant 64 : index
    %c0_4 = arith.constant 0 : index
    %3 = vector.load %arg3[%c64, %c0_4] : memref<184x32xf32, #tpu.memory_space<vmem>>, vector<3x16xf32>
    %cst = arith.constant 0.000000e+00 : f32
    %4 = vector.broadcast %cst : f32 to vector<1x20xf32>
    %5 = vector.extract_strided_slice %1 {offsets = [0, 0], sizes = [15, 20], strides = [1, 1]} : vector<16x20xf32> to vector<15x20xf32>
    %6 = tpu.concatenate %4, %5 in 0 : vector<1x20xf32>, vector<15x20xf32> -> vector<16x20xf32>
    %7 = vector.extract_strided_slice %1 {offsets = [1, 0], sizes = [15, 20], strides = [1, 1]} : vector<16x20xf32> to vector<15x20xf32>
    %8 = tpu.concatenate %7, %4 in 0 : vector<15x20xf32>, vector<1x20xf32> -> vector<16x20xf32>
    %9 = tpu.concatenate %6, %1, %8 in 1 : vector<16x20xf32>, vector<16x20xf32>, vector<16x20xf32> -> vector<16x60xf32>
    %cst_5 = arith.constant dense<0.000000e+00> : vector<16x16xf32>
    %10 = tpu.matmul %9, %2, %cst_5 {dimension_numbers = #tpu.dot_dimension_numbers<[1], [0], [0], [1], [0, 0, 1, 1], [], []>} : vector<16x60xf32>, vector<60x16xf32>, vector<16x16xf32> -> vector<16x16xf32>
    %11 = vector.extract_strided_slice %3 {offsets = [0, 0], sizes = [1, 16], strides = [1, 1]} : vector<3x16xf32> to vector<1x16xf32>
    %12 = vector.broadcast %11 : vector<1x16xf32> to vector<16x16xf32>
    %13 = arith.addf %10, %12 : vector<16x16xf32>
    %cst_6 = arith.constant 0.000000e+00 : f32
    %14 = vector.broadcast %cst_6 : f32 to vector<16x16xf32>
    %15 = arith.cmpf oge, %13, %14 : vector<16x16xf32>
    %cst_7 = arith.constant 3.000000e-01 : f32
    %16 = vector.broadcast %cst_7 : f32 to vector<16x16xf32>
    %17 = arith.mulf %16, %13 : vector<16x16xf32>
    %18 = arith.select %15, %13, %17 : vector<16x16xi1>, vector<16x16xf32>
    %cst_8 = arith.constant dense<0.000000e+00> : vector<16xf32>
    %19 = vector.multi_reduction <add>, %18, %cst_8 [0] : vector<16x16xf32> to vector<16xf32>
    %20 = vector.shape_cast %19 : vector<16xf32> to vector<1x16xf32>
    %cst_9 = arith.constant 1.600000e+01 : f32
    %21 = vector.broadcast %cst_9 : f32 to vector<1x16xf32>
    %22 = arith.divf %20, %21 : vector<1x16xf32>
    %23 = vector.broadcast %22 : vector<1x16xf32> to vector<16x16xf32>
    %24 = arith.subf %18, %23 : vector<16x16xf32>
    %25 = arith.mulf %24, %24 : vector<16x16xf32>
    %cst_10 = arith.constant dense<0.000000e+00> : vector<16xf32>
    %26 = vector.multi_reduction <add>, %25, %cst_10 [0] : vector<16x16xf32> to vector<16xf32>
    %27 = vector.shape_cast %26 : vector<16xf32> to vector<1x16xf32>
    %cst_11 = arith.constant 1.600000e+01 : f32
    %28 = vector.broadcast %cst_11 : f32 to vector<1x16xf32>
    %29 = arith.divf %27, %28 : vector<1x16xf32>
    %30 = vector.broadcast %22 : vector<1x16xf32> to vector<16x16xf32>
    %31 = arith.subf %18, %30 : vector<16x16xf32>
    %cst_12 = arith.constant 9.99999974E-6 : f32
    %32 = vector.broadcast %cst_12 : f32 to vector<1x16xf32>
    %33 = arith.addf %29, %32 : vector<1x16xf32>
    %34 = math.rsqrt %33 : vector<1x16xf32>
    %35 = vector.broadcast %34 : vector<1x16xf32> to vector<16x16xf32>
    %36 = arith.mulf %31, %35 : vector<16x16xf32>
    %37 = vector.extract_strided_slice %3 {offsets = [1, 0], sizes = [1, 16], strides = [1, 1]} : vector<3x16xf32> to vector<1x16xf32>
    %38 = vector.broadcast %37 : vector<1x16xf32> to vector<16x16xf32>
    %39 = arith.mulf %36, %38 : vector<16x16xf32>
    %40 = vector.extract_strided_slice %3 {offsets = [2, 0], sizes = [1, 16], strides = [1, 1]} : vector<3x16xf32> to vector<1x16xf32>
    %41 = vector.broadcast %40 : vector<1x16xf32> to vector<16x16xf32>
    %42 = arith.addf %39, %41 : vector<16x16xf32>
    %c72 = arith.constant 72 : index
    %c0_13 = arith.constant 0 : index
    %43 = vector.load %arg3[%c72, %c0_13] : memref<184x32xf32, #tpu.memory_space<vmem>>, vector<48x16xf32>
    %c120 = arith.constant 120 : index
    %c0_14 = arith.constant 0 : index
    %44 = vector.load %arg3[%c120, %c0_14] : memref<184x32xf32, #tpu.memory_space<vmem>>, vector<3x16xf32>
    %cst_15 = arith.constant 0.000000e+00 : f32
    %45 = vector.broadcast %cst_15 : f32 to vector<1x16xf32>
    %46 = vector.extract_strided_slice %42 {offsets = [0, 0], sizes = [15, 16], strides = [1, 1]} : vector<16x16xf32> to vector<15x16xf32>
    %47 = tpu.concatenate %45, %46 in 0 : vector<1x16xf32>, vector<15x16xf32> -> vector<16x16xf32>
    %48 = vector.extract_strided_slice %42 {offsets = [1, 0], sizes = [15, 16], strides = [1, 1]} : vector<16x16xf32> to vector<15x16xf32>
    %49 = tpu.concatenate %48, %45 in 0 : vector<15x16xf32>, vector<1x16xf32> -> vector<16x16xf32>
    %50 = tpu.concatenate %47, %42, %49 in 1 : vector<16x16xf32>, vector<16x16xf32>, vector<16x16xf32> -> vector<16x48xf32>
    %c0_16 = arith.constant 0 : index
    %c0_17 = arith.constant 0 : index
    %51 = vector.load %arg5[%c0_16, %c0_17] : memref<8x16xf32, #tpu.memory_space<vmem>>, vector<8x16xf32>
    %cst_18 = arith.constant dense<0.000000e+00> : vector<8x48xf32>
    %52 = tpu.matmul %51, %50, %cst_18 {dimension_numbers = #tpu.dot_dimension_numbers<[1], [0], [0], [1], [0, 0, 1, 1], [], []>} : vector<8x16xf32>, vector<16x48xf32>, vector<8x48xf32> -> vector<8x48xf32>
    %cst_19 = arith.constant dense<0.000000e+00> : vector<8x16xf32>
    %53 = tpu.matmul %52, %43, %cst_19 {dimension_numbers = #tpu.dot_dimension_numbers<[1], [0], [0], [1], [0, 0, 1, 1], [], []>} : vector<8x48xf32>, vector<48x16xf32>, vector<8x16xf32> -> vector<8x16xf32>
    %54 = vector.extract_strided_slice %44 {offsets = [0, 0], sizes = [1, 16], strides = [1, 1]} : vector<3x16xf32> to vector<1x16xf32>
    %55 = vector.broadcast %54 : vector<1x16xf32> to vector<8x16xf32>
    %56 = arith.addf %53, %55 : vector<8x16xf32>
    %cst_20 = arith.constant 0.000000e+00 : f32
    %57 = vector.broadcast %cst_20 : f32 to vector<8x16xf32>
    %58 = arith.cmpf oge, %56, %57 : vector<8x16xf32>
    %cst_21 = arith.constant 3.000000e-01 : f32
    %59 = vector.broadcast %cst_21 : f32 to vector<8x16xf32>
    %60 = arith.mulf %59, %56 : vector<8x16xf32>
    %61 = arith.select %58, %56, %60 : vector<8x16xi1>, vector<8x16xf32>
    %cst_22 = arith.constant dense<0.000000e+00> : vector<16xf32>
    %62 = vector.multi_reduction <add>, %61, %cst_22 [0] : vector<8x16xf32> to vector<16xf32>
    %63 = vector.shape_cast %62 : vector<16xf32> to vector<1x16xf32>
    %cst_23 = arith.constant 8.000000e+00 : f32
    %64 = vector.broadcast %cst_23 : f32 to vector<1x16xf32>
    %65 = arith.divf %63, %64 : vector<1x16xf32>
    %66 = vector.broadcast %65 : vector<1x16xf32> to vector<8x16xf32>
    %67 = arith.subf %61, %66 : vector<8x16xf32>
    %68 = arith.mulf %67, %67 : vector<8x16xf32>
    %cst_24 = arith.constant dense<0.000000e+00> : vector<16xf32>
    %69 = vector.multi_reduction <add>, %68, %cst_24 [0] : vector<8x16xf32> to vector<16xf32>
    %70 = vector.shape_cast %69 : vector<16xf32> to vector<1x16xf32>
    %cst_25 = arith.constant 8.000000e+00 : f32
    %71 = vector.broadcast %cst_25 : f32 to vector<1x16xf32>
    %72 = arith.divf %70, %71 : vector<1x16xf32>
    %73 = vector.broadcast %65 : vector<1x16xf32> to vector<8x16xf32>
    %74 = arith.subf %61, %73 : vector<8x16xf32>
    %cst_26 = arith.constant 9.99999974E-6 : f32
    %75 = vector.broadcast %cst_26 : f32 to vector<1x16xf32>
    %76 = arith.addf %72, %75 : vector<1x16xf32>
    %77 = math.rsqrt %76 : vector<1x16xf32>
    %78 = vector.broadcast %77 : vector<1x16xf32> to vector<8x16xf32>
    %79 = arith.mulf %74, %78 : vector<8x16xf32>
    %80 = vector.extract_strided_slice %44 {offsets = [1, 0], sizes = [1, 16], strides = [1, 1]} : vector<3x16xf32> to vector<1x16xf32>
    %81 = vector.broadcast %80 : vector<1x16xf32> to vector<8x16xf32>
    %82 = arith.mulf %79, %81 : vector<8x16xf32>
    %83 = vector.extract_strided_slice %44 {offsets = [2, 0], sizes = [1, 16], strides = [1, 1]} : vector<3x16xf32> to vector<1x16xf32>
    %84 = vector.broadcast %83 : vector<1x16xf32> to vector<8x16xf32>
    %85 = arith.addf %82, %84 : vector<8x16xf32>
    %c128 = arith.constant 128 : index
    %c0_27 = arith.constant 0 : index
    %86 = vector.load %arg3[%c128, %c0_27] : memref<184x32xf32, #tpu.memory_space<vmem>>, vector<48x32xf32>
    %c176 = arith.constant 176 : index
    %c0_28 = arith.constant 0 : index
    %87 = vector.load %arg3[%c176, %c0_28] : memref<184x32xf32, #tpu.memory_space<vmem>>, vector<3x32xf32>
    %cst_29 = arith.constant 0.000000e+00 : f32
    %88 = vector.broadcast %cst_29 : f32 to vector<1x16xf32>
    %89 = vector.extract_strided_slice %85 {offsets = [0, 0], sizes = [7, 16], strides = [1, 1]} : vector<8x16xf32> to vector<7x16xf32>
    %90 = tpu.concatenate %88, %89 in 0 : vector<1x16xf32>, vector<7x16xf32> -> vector<8x16xf32>
    %91 = vector.extract_strided_slice %85 {offsets = [1, 0], sizes = [7, 16], strides = [1, 1]} : vector<8x16xf32> to vector<7x16xf32>
    %92 = tpu.concatenate %91, %88 in 0 : vector<7x16xf32>, vector<1x16xf32> -> vector<8x16xf32>
    %93 = tpu.concatenate %90, %85, %92 in 1 : vector<8x16xf32>, vector<8x16xf32>, vector<8x16xf32> -> vector<8x48xf32>
    %c0_30 = arith.constant 0 : index
    %c0_31 = arith.constant 0 : index
    %94 = vector.load %arg6[%c0_30, %c0_31] : memref<4x8xf32, #tpu.memory_space<vmem>>, vector<4x8xf32>
    %cst_32 = arith.constant dense<0.000000e+00> : vector<4x48xf32>
    %95 = tpu.matmul %94, %93, %cst_32 {dimension_numbers = #tpu.dot_dimension_numbers<[1], [0], [0], [1], [0, 0, 1, 1], [], []>} : vector<4x8xf32>, vector<8x48xf32>, vector<4x48xf32> -> vector<4x48xf32>
    %cst_33 = arith.constant dense<0.000000e+00> : vector<4x32xf32>
    %96 = tpu.matmul %95, %86, %cst_33 {dimension_numbers = #tpu.dot_dimension_numbers<[1], [0], [0], [1], [0, 0, 1, 1], [], []>} : vector<4x48xf32>, vector<48x32xf32>, vector<4x32xf32> -> vector<4x32xf32>
    %97 = vector.extract_strided_slice %87 {offsets = [0, 0], sizes = [1, 32], strides = [1, 1]} : vector<3x32xf32> to vector<1x32xf32>
    %98 = vector.broadcast %97 : vector<1x32xf32> to vector<4x32xf32>
    %99 = arith.addf %96, %98 : vector<4x32xf32>
    %cst_34 = arith.constant 0.000000e+00 : f32
    %100 = vector.broadcast %cst_34 : f32 to vector<4x32xf32>
    %101 = arith.cmpf oge, %99, %100 : vector<4x32xf32>
    %cst_35 = arith.constant 3.000000e-01 : f32
    %102 = vector.broadcast %cst_35 : f32 to vector<4x32xf32>
    %103 = arith.mulf %102, %99 : vector<4x32xf32>
    %104 = arith.select %101, %99, %103 : vector<4x32xi1>, vector<4x32xf32>
    %cst_36 = arith.constant dense<0.000000e+00> : vector<32xf32>
    %105 = vector.multi_reduction <add>, %104, %cst_36 [0] : vector<4x32xf32> to vector<32xf32>
    %106 = vector.shape_cast %105 : vector<32xf32> to vector<1x32xf32>
    %cst_37 = arith.constant 4.000000e+00 : f32
    %107 = vector.broadcast %cst_37 : f32 to vector<1x32xf32>
    %108 = arith.divf %106, %107 : vector<1x32xf32>
    %109 = vector.broadcast %108 : vector<1x32xf32> to vector<4x32xf32>
    %110 = arith.subf %104, %109 : vector<4x32xf32>
    %111 = arith.mulf %110, %110 : vector<4x32xf32>
    %cst_38 = arith.constant dense<0.000000e+00> : vector<32xf32>
    %112 = vector.multi_reduction <add>, %111, %cst_38 [0] : vector<4x32xf32> to vector<32xf32>
    %113 = vector.shape_cast %112 : vector<32xf32> to vector<1x32xf32>
    %cst_39 = arith.constant 4.000000e+00 : f32
    %114 = vector.broadcast %cst_39 : f32 to vector<1x32xf32>
    %115 = arith.divf %113, %114 : vector<1x32xf32>
    %116 = vector.broadcast %108 : vector<1x32xf32> to vector<4x32xf32>
    %117 = arith.subf %104, %116 : vector<4x32xf32>
    %cst_40 = arith.constant 9.99999974E-6 : f32
    %118 = vector.broadcast %cst_40 : f32 to vector<1x32xf32>
    %119 = arith.addf %115, %118 : vector<1x32xf32>
    %120 = math.rsqrt %119 : vector<1x32xf32>
    %121 = vector.broadcast %120 : vector<1x32xf32> to vector<4x32xf32>
    %122 = arith.mulf %117, %121 : vector<4x32xf32>
    %123 = vector.extract_strided_slice %87 {offsets = [1, 0], sizes = [1, 32], strides = [1, 1]} : vector<3x32xf32> to vector<1x32xf32>
    %124 = vector.broadcast %123 : vector<1x32xf32> to vector<4x32xf32>
    %125 = arith.mulf %122, %124 : vector<4x32xf32>
    %126 = vector.extract_strided_slice %87 {offsets = [2, 0], sizes = [1, 32], strides = [1, 1]} : vector<3x32xf32> to vector<1x32xf32>
    %127 = vector.broadcast %126 : vector<1x32xf32> to vector<4x32xf32>
    %128 = arith.addf %125, %127 : vector<4x32xf32>
    %c0_41 = arith.constant 0 : index
    %c0_42 = arith.constant 0 : index
    %129 = vector.load %arg4[%c0_41, %c0_42] : memref<72x96xf32, #tpu.memory_space<vmem>>, vector<32x96xf32>
    %c32 = arith.constant 32 : index
    %c0_43 = arith.constant 0 : index
    %130 = vector.load %arg4[%c32, %c0_43] : memref<72x96xf32, #tpu.memory_space<vmem>>, vector<32x96xf32>
    %c64_44 = arith.constant 64 : index
    %c0_45 = arith.constant 0 : index
    %131 = vector.load %arg4[%c64_44, %c0_45] : memref<72x96xf32, #tpu.memory_space<vmem>>, vector<1x96xf32>
    %c65 = arith.constant 65 : index
    %c0_46 = arith.constant 0 : index
    %132 = vector.load %arg4[%c65, %c0_46] : memref<72x96xf32, #tpu.memory_space<vmem>>, vector<1x96xf32>
    %c0_47 = arith.constant 0 : index
    %c0_48 = arith.constant 0 : index
    %c0_49 = arith.constant 0 : index
    %133 = vector.load %arg2[%c0_47, %c0_48, %c0_49] : memref<1x1x32xf32, #tpu.memory_space<vmem>>, vector<1x1x32xf32>
    %134 = vector.shape_cast %133 : vector<1x1x32xf32> to vector<1x32xf32>
    %cst_50 = arith.constant dense<0.000000e+00> : vector<4x96xf32>
    %135 = tpu.matmul %128, %129, %cst_50 {dimension_numbers = #tpu.dot_dimension_numbers<[1], [0], [0], [1], [0, 0, 1, 1], [], []>} : vector<4x32xf32>, vector<32x96xf32>, vector<4x96xf32> -> vector<4x96xf32>
    %136 = vector.broadcast %131 : vector<1x96xf32> to vector<4x96xf32>
    %137 = arith.addf %135, %136 : vector<4x96xf32>
    %cst_51 = arith.constant 0.000000e+00 : f32
    %138 = vector.broadcast %cst_51 : f32 to vector<1x32xf32>
    %139 = vector.extract_strided_slice %137 {offsets = [0, 0], sizes = [1, 96], strides = [1, 1]} : vector<4x96xf32> to vector<1x96xf32>
    %cst_52 = arith.constant dense<0.000000e+00> : vector<1x96xf32>
    %140 = tpu.matmul %138, %130, %cst_52 {dimension_numbers = #tpu.dot_dimension_numbers<[1], [0], [0], [1], [0, 0, 1, 1], [], []>} : vector<1x32xf32>, vector<32x96xf32>, vector<1x96xf32> -> vector<1x96xf32>
    %141 = arith.addf %140, %132 : vector<1x96xf32>
    %142 = vector.extract_strided_slice %139 {offsets = [0, 0], sizes = [1, 32], strides = [1, 1]} : vector<1x96xf32> to vector<1x32xf32>
    %143 = vector.extract_strided_slice %141 {offsets = [0, 0], sizes = [1, 32], strides = [1, 1]} : vector<1x96xf32> to vector<1x32xf32>
    %144 = arith.addf %142, %143 : vector<1x32xf32>
    %145 = arith.negf %144 : vector<1x32xf32>
    %146 = math.exp %145 : vector<1x32xf32>
    %cst_53 = arith.constant 1.000000e+00 : f32
    %147 = vector.broadcast %cst_53 : f32 to vector<1x32xf32>
    %148 = arith.addf %147, %146 : vector<1x32xf32>
    %149 = arith.divf %147, %148 : vector<1x32xf32>
    %150 = vector.extract_strided_slice %139 {offsets = [0, 32], sizes = [1, 32], strides = [1, 1]} : vector<1x96xf32> to vector<1x32xf32>
    %151 = vector.extract_strided_slice %141 {offsets = [0, 32], sizes = [1, 32], strides = [1, 1]} : vector<1x96xf32> to vector<1x32xf32>
    %152 = arith.addf %150, %151 : vector<1x32xf32>
    %153 = arith.negf %152 : vector<1x32xf32>
    %154 = math.exp %153 : vector<1x32xf32>
    %cst_54 = arith.constant 1.000000e+00 : f32
    %155 = vector.broadcast %cst_54 : f32 to vector<1x32xf32>
    %156 = arith.addf %155, %154 : vector<1x32xf32>
    %157 = arith.divf %155, %156 : vector<1x32xf32>
    %158 = vector.extract_strided_slice %139 {offsets = [0, 64], sizes = [1, 32], strides = [1, 1]} : vector<1x96xf32> to vector<1x32xf32>
    %159 = vector.extract_strided_slice %141 {offsets = [0, 64], sizes = [1, 32], strides = [1, 1]} : vector<1x96xf32> to vector<1x32xf32>
    %160 = arith.mulf %149, %159 : vector<1x32xf32>
    %161 = arith.addf %158, %160 : vector<1x32xf32>
    %162 = math.tanh %161 : vector<1x32xf32>
    %cst_55 = arith.constant 1.000000e+00 : f32
    %163 = vector.broadcast %cst_55 : f32 to vector<1x32xf32>
    %164 = arith.subf %163, %157 : vector<1x32xf32>
    %165 = arith.mulf %164, %162 : vector<1x32xf32>
    %166 = arith.mulf %157, %138 : vector<1x32xf32>
    %167 = arith.addf %165, %166 : vector<1x32xf32>
    %cst_56 = arith.constant 0.000000e+00 : f32
    %168 = vector.broadcast %cst_56 : f32 to vector<1x32xf32>
    %169 = arith.cmpf ogt, %134, %168 : vector<1x32xf32>
    %170 = arith.select %169, %167, %138 : vector<1x32xi1>, vector<1x32xf32>
    %cst_57 = arith.constant 0.000000e+00 : f32
    %171 = vector.broadcast %cst_57 : f32 to vector<1x32xf32>
    %172 = arith.select %169, %167, %171 : vector<1x32xi1>, vector<1x32xf32>
    %c0_58 = arith.constant 0 : index
    %c0_59 = arith.constant 0 : index
    %c0_60 = arith.constant 0 : index
    %173 = vector.load %arg7[%c0_58, %c0_59, %c0_60] : memref<1x5x32xf32, #tpu.memory_space<vmem>>, vector<1x1x32xf32>
    %174 = vector.shape_cast %173 : vector<1x1x32xf32> to vector<1x32xf32>
    %175 = vector.shape_cast %172 : vector<1x32xf32> to vector<1x1x32xf32>
    tpu.vector_store %arg7[%c0_58, %c0_59, %c0_60], %175 {strides = array<i32>} : memref<1x5x32xf32, #tpu.memory_space<vmem>>, vector<1x1x32xf32>,
    %176 = vector.extract_strided_slice %137 {offsets = [1, 0], sizes = [1, 96], strides = [1, 1]} : vector<4x96xf32> to vector<1x96xf32>
    %cst_61 = arith.constant dense<0.000000e+00> : vector<1x96xf32>
    %177 = tpu.matmul %170, %130, %cst_61 {dimension_numbers = #tpu.dot_dimension_numbers<[1], [0], [0], [1], [0, 0, 1, 1], [], []>} : vector<1x32xf32>, vector<32x96xf32>, vector<1x96xf32> -> vector<1x96xf32>
    %178 = arith.addf %177, %132 : vector<1x96xf32>
    %179 = vector.extract_strided_slice %176 {offsets = [0, 0], sizes = [1, 32], strides = [1, 1]} : vector<1x96xf32> to vector<1x32xf32>
    %180 = vector.extract_strided_slice %178 {offsets = [0, 0], sizes = [1, 32], strides = [1, 1]} : vector<1x96xf32> to vector<1x32xf32>
    %181 = arith.addf %179, %180 : vector<1x32xf32>
    %182 = arith.negf %181 : vector<1x32xf32>
    %183 = math.exp %182 : vector<1x32xf32>
    %cst_62 = arith.constant 1.000000e+00 : f32
    %184 = vector.broadcast %cst_62 : f32 to vector<1x32xf32>
    %185 = arith.addf %184, %183 : vector<1x32xf32>
    %186 = arith.divf %184, %185 : vector<1x32xf32>
    %187 = vector.extract_strided_slice %176 {offsets = [0, 32], sizes = [1, 32], strides = [1, 1]} : vector<1x96xf32> to vector<1x32xf32>
    %188 = vector.extract_strided_slice %178 {offsets = [0, 32], sizes = [1, 32], strides = [1, 1]} : vector<1x96xf32> to vector<1x32xf32>
    %189 = arith.addf %187, %188 : vector<1x32xf32>
    %190 = arith.negf %189 : vector<1x32xf32>
    %191 = math.exp %190 : vector<1x32xf32>
    %cst_63 = arith.constant 1.000000e+00 : f32
    %192 = vector.broadcast %cst_63 : f32 to vector<1x32xf32>
    %193 = arith.addf %192, %191 : vector<1x32xf32>
    %194 = arith.divf %192, %193 : vector<1x32xf32>
    %195 = vector.extract_strided_slice %176 {offsets = [0, 64], sizes = [1, 32], strides = [1, 1]} : vector<1x96xf32> to vector<1x32xf32>
    %196 = vector.extract_strided_slice %178 {offsets = [0, 64], sizes = [1, 32], strides = [1, 1]} : vector<1x96xf32> to vector<1x32xf32>
    %197 = arith.mulf %186, %196 : vector<1x32xf32>
    %198 = arith.addf %195, %197 : vector<1x32xf32>
    %199 = math.tanh %198 : vector<1x32xf32>
    %cst_64 = arith.constant 1.000000e+00 : f32
    %200 = vector.broadcast %cst_64 : f32 to vector<1x32xf32>
    %201 = arith.subf %200, %194 : vector<1x32xf32>
    %202 = arith.mulf %201, %199 : vector<1x32xf32>
    %203 = arith.mulf %194, %170 : vector<1x32xf32>
    %204 = arith.addf %202, %203 : vector<1x32xf32>
    %cst_65 = arith.constant 1.000000e+00 : f32
    %205 = vector.broadcast %cst_65 : f32 to vector<1x32xf32>
    %206 = arith.cmpf ogt, %134, %205 : vector<1x32xf32>
    %207 = arith.select %206, %204, %170 : vector<1x32xi1>, vector<1x32xf32>
    %cst_66 = arith.constant 0.000000e+00 : f32
    %208 = vector.broadcast %cst_66 : f32 to vector<1x32xf32>
    %209 = arith.select %206, %204, %208 : vector<1x32xi1>, vector<1x32xf32>
    %c0_67 = arith.constant 0 : index
    %c1 = arith.constant 1 : index
    %c0_68 = arith.constant 0 : index
    %210 = vector.load %arg7[%c0_67, %c1, %c0_68] : memref<1x5x32xf32, #tpu.memory_space<vmem>>, vector<1x1x32xf32>
    %211 = vector.shape_cast %210 : vector<1x1x32xf32> to vector<1x32xf32>
    %212 = vector.shape_cast %209 : vector<1x32xf32> to vector<1x1x32xf32>
    tpu.vector_store %arg7[%c0_67, %c1, %c0_68], %212 {strides = array<i32>} : memref<1x5x32xf32, #tpu.memory_space<vmem>>, vector<1x1x32xf32>,
    %213 = vector.extract_strided_slice %137 {offsets = [2, 0], sizes = [1, 96], strides = [1, 1]} : vector<4x96xf32> to vector<1x96xf32>
    %cst_69 = arith.constant dense<0.000000e+00> : vector<1x96xf32>
    %214 = tpu.matmul %207, %130, %cst_69 {dimension_numbers = #tpu.dot_dimension_numbers<[1], [0], [0], [1], [0, 0, 1, 1], [], []>} : vector<1x32xf32>, vector<32x96xf32>, vector<1x96xf32> -> vector<1x96xf32>
    %215 = arith.addf %214, %132 : vector<1x96xf32>
    %216 = vector.extract_strided_slice %213 {offsets = [0, 0], sizes = [1, 32], strides = [1, 1]} : vector<1x96xf32> to vector<1x32xf32>
    %217 = vector.extract_strided_slice %215 {offsets = [0, 0], sizes = [1, 32], strides = [1, 1]} : vector<1x96xf32> to vector<1x32xf32>
    %218 = arith.addf %216, %217 : vector<1x32xf32>
    %219 = arith.negf %218 : vector<1x32xf32>
    %220 = math.exp %219 : vector<1x32xf32>
    %cst_70 = arith.constant 1.000000e+00 : f32
    %221 = vector.broadcast %cst_70 : f32 to vector<1x32xf32>
    %222 = arith.addf %221, %220 : vector<1x32xf32>
    %223 = arith.divf %221, %222 : vector<1x32xf32>
    %224 = vector.extract_strided_slice %213 {offsets = [0, 32], sizes = [1, 32], strides = [1, 1]} : vector<1x96xf32> to vector<1x32xf32>
    %225 = vector.extract_strided_slice %215 {offsets = [0, 32], sizes = [1, 32], strides = [1, 1]} : vector<1x96xf32> to vector<1x32xf32>
    %226 = arith.addf %224, %225 : vector<1x32xf32>
    %227 = arith.negf %226 : vector<1x32xf32>
    %228 = math.exp %227 : vector<1x32xf32>
    %cst_71 = arith.constant 1.000000e+00 : f32
    %229 = vector.broadcast %cst_71 : f32 to vector<1x32xf32>
    %230 = arith.addf %229, %228 : vector<1x32xf32>
    %231 = arith.divf %229, %230 : vector<1x32xf32>
    %232 = vector.extract_strided_slice %213 {offsets = [0, 64], sizes = [1, 32], strides = [1, 1]} : vector<1x96xf32> to vector<1x32xf32>
    %233 = vector.extract_strided_slice %215 {offsets = [0, 64], sizes = [1, 32], strides = [1, 1]} : vector<1x96xf32> to vector<1x32xf32>
    %234 = arith.mulf %223, %233 : vector<1x32xf32>
    %235 = arith.addf %232, %234 : vector<1x32xf32>
    %236 = math.tanh %235 : vector<1x32xf32>
    %cst_72 = arith.constant 1.000000e+00 : f32
    %237 = vector.broadcast %cst_72 : f32 to vector<1x32xf32>
    %238 = arith.subf %237, %231 : vector<1x32xf32>
    %239 = arith.mulf %238, %236 : vector<1x32xf32>
    %240 = arith.mulf %231, %207 : vector<1x32xf32>
    %241 = arith.addf %239, %240 : vector<1x32xf32>
    %cst_73 = arith.constant 2.000000e+00 : f32
    %242 = vector.broadcast %cst_73 : f32 to vector<1x32xf32>
    %243 = arith.cmpf ogt, %134, %242 : vector<1x32xf32>
    %244 = arith.select %243, %241, %207 : vector<1x32xi1>, vector<1x32xf32>
    %cst_74 = arith.constant 0.000000e+00 : f32
    %245 = vector.broadcast %cst_74 : f32 to vector<1x32xf32>
    %246 = arith.select %243, %241, %245 : vector<1x32xi1>, vector<1x32xf32>
    %c0_75 = arith.constant 0 : index
    %c2 = arith.constant 2 : index
    %c0_76 = arith.constant 0 : index
    %247 = vector.load %arg7[%c0_75, %c2, %c0_76] : memref<1x5x32xf32, #tpu.memory_space<vmem>>, vector<1x1x32xf32>
    %248 = vector.shape_cast %247 : vector<1x1x32xf32> to vector<1x32xf32>
    %249 = vector.shape_cast %246 : vector<1x32xf32> to vector<1x1x32xf32>
    tpu.vector_store %arg7[%c0_75, %c2, %c0_76], %249 {strides = array<i32>} : memref<1x5x32xf32, #tpu.memory_space<vmem>>, vector<1x1x32xf32>,
    %250 = vector.extract_strided_slice %137 {offsets = [3, 0], sizes = [1, 96], strides = [1, 1]} : vector<4x96xf32> to vector<1x96xf32>
    %cst_77 = arith.constant dense<0.000000e+00> : vector<1x96xf32>
    %251 = tpu.matmul %244, %130, %cst_77 {dimension_numbers = #tpu.dot_dimension_numbers<[1], [0], [0], [1], [0, 0, 1, 1], [], []>} : vector<1x32xf32>, vector<32x96xf32>, vector<1x96xf32> -> vector<1x96xf32>
    %252 = arith.addf %251, %132 : vector<1x96xf32>
    %253 = vector.extract_strided_slice %250 {offsets = [0, 0], sizes = [1, 32], strides = [1, 1]} : vector<1x96xf32> to vector<1x32xf32>
    %254 = vector.extract_strided_slice %252 {offsets = [0, 0], sizes = [1, 32], strides = [1, 1]} : vector<1x96xf32> to vector<1x32xf32>
    %255 = arith.addf %253, %254 : vector<1x32xf32>
    %256 = arith.negf %255 : vector<1x32xf32>
    %257 = math.exp %256 : vector<1x32xf32>
    %cst_78 = arith.constant 1.000000e+00 : f32
    %258 = vector.broadcast %cst_78 : f32 to vector<1x32xf32>
    %259 = arith.addf %258, %257 : vector<1x32xf32>
    %260 = arith.divf %258, %259 : vector<1x32xf32>
    %261 = vector.extract_strided_slice %250 {offsets = [0, 32], sizes = [1, 32], strides = [1, 1]} : vector<1x96xf32> to vector<1x32xf32>
    %262 = vector.extract_strided_slice %252 {offsets = [0, 32], sizes = [1, 32], strides = [1, 1]} : vector<1x96xf32> to vector<1x32xf32>
    %263 = arith.addf %261, %262 : vector<1x32xf32>
    %264 = arith.negf %263 : vector<1x32xf32>
    %265 = math.exp %264 : vector<1x32xf32>
    %cst_79 = arith.constant 1.000000e+00 : f32
    %266 = vector.broadcast %cst_79 : f32 to vector<1x32xf32>
    %267 = arith.addf %266, %265 : vector<1x32xf32>
    %268 = arith.divf %266, %267 : vector<1x32xf32>
    %269 = vector.extract_strided_slice %250 {offsets = [0, 64], sizes = [1, 32], strides = [1, 1]} : vector<1x96xf32> to vector<1x32xf32>
    %270 = vector.extract_strided_slice %252 {offsets = [0, 64], sizes = [1, 32], strides = [1, 1]} : vector<1x96xf32> to vector<1x32xf32>
    %271 = arith.mulf %260, %270 : vector<1x32xf32>
    %272 = arith.addf %269, %271 : vector<1x32xf32>
    %273 = math.tanh %272 : vector<1x32xf32>
    %cst_80 = arith.constant 1.000000e+00 : f32
    %274 = vector.broadcast %cst_80 : f32 to vector<1x32xf32>
    %275 = arith.subf %274, %268 : vector<1x32xf32>
    %276 = arith.mulf %275, %273 : vector<1x32xf32>
    %277 = arith.mulf %268, %244 : vector<1x32xf32>
    %278 = arith.addf %276, %277 : vector<1x32xf32>
    %cst_81 = arith.constant 3.000000e+00 : f32
    %279 = vector.broadcast %cst_81 : f32 to vector<1x32xf32>
    %280 = arith.cmpf ogt, %134, %279 : vector<1x32xf32>
    %281 = arith.select %280, %278, %244 : vector<1x32xi1>, vector<1x32xf32>
    %cst_82 = arith.constant 0.000000e+00 : f32
    %282 = vector.broadcast %cst_82 : f32 to vector<1x32xf32>
    %283 = arith.select %280, %278, %282 : vector<1x32xi1>, vector<1x32xf32>
    %c0_83 = arith.constant 0 : index
    %c3 = arith.constant 3 : index
    %c0_84 = arith.constant 0 : index
    %284 = vector.load %arg7[%c0_83, %c3, %c0_84] : memref<1x5x32xf32, #tpu.memory_space<vmem>>, vector<1x1x32xf32>
    %285 = vector.shape_cast %284 : vector<1x1x32xf32> to vector<1x32xf32>
    %286 = vector.shape_cast %283 : vector<1x32xf32> to vector<1x1x32xf32>
    tpu.vector_store %arg7[%c0_83, %c3, %c0_84], %286 {strides = array<i32>} : memref<1x5x32xf32, #tpu.memory_space<vmem>>, vector<1x1x32xf32>,
    %c0_85 = arith.constant 0 : index
    %c4 = arith.constant 4 : index
    %c0_86 = arith.constant 0 : index
    %287 = vector.load %arg7[%c0_85, %c4, %c0_86] : memref<1x5x32xf32, #tpu.memory_space<vmem>>, vector<1x1x32xf32>
    %288 = vector.shape_cast %287 : vector<1x1x32xf32> to vector<1x32xf32>
    %289 = vector.shape_cast %281 : vector<1x32xf32> to vector<1x1x32xf32>
    tpu.vector_store %arg7[%c0_85, %c4, %c0_86], %289 {strides = array<i32>} : memref<1x5x32xf32, #tpu.memory_space<vmem>>, vector<1x1x32xf32>,
    return
  }
  func.func @transform_0(%arg0: i32) -> (i32, i32, i32) {
    %c0_i32 = arith.constant 0 : i32
    %c0_i32_0 = arith.constant 0 : i32
    %c0_i32_1 = arith.constant 0 : i32
    return %arg0, %c0_i32, %c0_i32_0 : i32, i32, i32
  }
  func.func @transform_1(%arg0: i32) -> (i32, i32, i32) {
    %c0_i32 = arith.constant 0 : i32
    %c0_i32_0 = arith.constant 0 : i32
    %c0_i32_1 = arith.constant 0 : i32
    return %arg0, %c0_i32, %c0_i32_0 : i32, i32, i32
  }
  func.func @transform_2(%arg0: i32) -> (i32, i32) {
    %c0_i32 = arith.constant 0 : i32
    %c0_i32_0 = arith.constant 0 : i32
    %c0_i32_1 = arith.constant 0 : i32
    return %c0_i32, %c0_i32_0 : i32, i32
  }
  func.func @transform_3(%arg0: i32) -> (i32, i32) {
    %c0_i32 = arith.constant 0 : i32
    %c0_i32_0 = arith.constant 0 : i32
    %c0_i32_1 = arith.constant 0 : i32
    return %c0_i32, %c0_i32_0 : i32, i32
  }
  func.func @transform_4(%arg0: i32) -> (i32, i32) {
    %c0_i32 = arith.constant 0 : i32
    %c0_i32_0 = arith.constant 0 : i32
    %c0_i32_1 = arith.constant 0 : i32
    return %c0_i32, %c0_i32_0 : i32, i32
  }
  func.func @transform_5(%arg0: i32) -> (i32, i32) {
    %c0_i32 = arith.constant 0 : i32
    %c0_i32_0 = arith.constant 0 : i32
    %c0_i32_1 = arith.constant 0 : i32
    return %c0_i32, %c0_i32_0 : i32, i32
  }
  func.func @transform_6(%arg0: i32) -> (i32, i32, i32) {
    %c0_i32 = arith.constant 0 : i32
    %c0_i32_0 = arith.constant 0 : i32
    %c0_i32_1 = arith.constant 0 : i32
    return %arg0, %c0_i32, %c0_i32_0 : i32, i32, i32
  }
}

</mosaic_0001>

<bundles_post_ra>
// kernel: reference_encoder.1
= control target key start
LH: loop header
LB: loop body
LE: loop exit
PB: predicated region body
PF: predicated region fallthrough
CT: control target
= control target key end

     0   :  { %s1928_s21 = smov 0   ;;  %s2228_s0 = inlined_call_operand.vmem [shape: f32[3,16,20], index: 0, kind: input, shape index: {}]   ;;  %s2229_s1 = inlined_call_operand.vmem [shape: f32[3,1,32], index: 1, kind: input, shape index: {}]   ;;  %s2230_s2 = inlined_call_operand.vmem [shape: f32[184,32], index: 2, kind: input, shape index: {}]   ;;  %s2231_s3 = inlined_call_operand.vmem [shape: f32[72,96], index: 3, kind: input, shape index: {}]   ;;  %s2232_s4 = inlined_call_operand.vmem [shape: f32[8,16], index: 4, kind: input, shape index: {}]   ;;  %s2233_s5 = inlined_call_operand.vmem [shape: f32[4,8], index: 5, kind: input, shape index: {}]   ;;  %s2234_s6 = inlined_call_operand.vmem [shape: f32[3,5,32], index: 6, kind: output, shape index: {}]  }
   0x1 LB: > { %s1549_s22 = sadd.s32 4294967295, %s1880_s21   ;;  %p1553_p0 = scmp.ge.s32.totalorder %s1880_s21, 1  ;;  %s1880_s21 = sphi %s1928_s21, %s16_s21  }
   0x2   : > { %p220_p1 = scmp.lt.s32.totalorder %s1880_s21, 4 }
   0x4   : > { %p221_p2 = pnand %p1553_p0, %p220_p1 }
   0x5   : > { %p252_p3 = scmp.lt.s32.totalorder (!%p221_p2), %s1549_s22, 2  ;;  %v266_v0 = vld [vmem:[%s2230_s2] sm:$0xff] (!%p221_p2)  ;;  %v267_v1 = vld [vmem:[%s2230_s2 + $0x8] sm:$0xff] (!%p221_p2)  ;;  %v268_v2 = vld [vmem:[%s2230_s2 + $0x10] sm:$0xff] (!%p221_p2)  ;;  %vm284_vm0 = vcmask (!%p221_p2), 1046528   ;;  %vm320_vm1 = vcmask (!%p221_p2), 1043456   ;;  %v309_v30 = vlaneseq (!%p221_p2) }
   0x6   : > { %224 = sbr.rel (%p221_p2) target bundleno = 4442 (0x115a), region = 44  ;;  %v1746_v3 = vpack.c.bf16 (!%p221_p2), %v267_v1, %v266_v0  ;;  %v269_v4 = vld [vmem:[%s2230_s2 + $0x18] sm:$0xff] (!%p221_p2)  ;;  %v270_v6 = vld [vmem:[%s2230_s2 + $0x20] sm:$0xff] (!%p221_p2)  ;;  %v271_v7 = vld [vmem:[%s2230_s2 + $0x28] sm:$0xff] (!%p221_p2)  ;;  %s1882_s19 = smov (!%p221_p2), 20   ;;  %vm277_vm2 = vcmask (!%p221_p2), 1040384  }
   0x7   : > { %v1750_v5 = vpack.c.bf16 (!%p221_p2), %v269_v4, %v268_v2  ;;  %v1754_v8 = vpack.c.bf16 (!%p221_p2), %v271_v7, %v270_v6  ;;  %v272_v9 = vld [vmem:[%s2230_s2 + $0x30] sm:$0xff] (!%p221_p2)  ;;  %v273_v12 = vld [vmem:[%s2230_s2 + $0x38] sm:$0xf] (!%p221_p2)  ;;  %s1883_s20 = smov (!%p221_p2), 40   ;;  %vm1884_vm3 = vmmov (!%p221_p2), 1   ;;  %vm303_vm5 = vcmask (!%p221_p2), 162816  }
   0x8   : > { %1747 = vmatprep.subr.bf16.mxu0 (!%p221_p2), %v1746_v3  ;;  %v1758_v18 = vpack.c.bf16 (!%p221_p2), %v273_v12, %v272_v9  ;;  %vm1759_vm4 = vmpackc.low (!%p221_p2), %vm320_vm1, %vm1884_vm3  ;;  %vm306_vm6 = vcmask (!%p221_p2), 326656   ;;  %vm313_vm7 = vcmask (!%p221_p2), 490496   ;;  %v1971_v31 = vshrl.u32 (!%p221_p2), %v309_v30, 7  ;;  %v274_v33 = vld [vmem:[%s2230_s2 + $0x40] sm:$0x7] (!%p221_p2)  ;;  %s1888_s25 = smov (!%p221_p2), 16  }
   0x9   : > { %1749 = vmatpush3.bf16.msra.mxu0 (!%p221_p2), %v1746_v3  ;;  %vm405_vm9 = vcmask (!%p221_p2), 130048   ;;  %vm1886_vm11 = vmmov (!%p221_p2), 0   ;;  %s1889_s26 = smov (!%p221_p2), 32   ;;  %vm482_vm12 = vcmask (!%p221_p2), 261120   ;;  %vm563_vm13 = vcmask (!%p221_p2), 392192   ;;  %s1890_s12 = smov (!%p221_p2), 64  }
   0xa   : > { %1751 = vmatprep.subr.bf16.mxu0 (!%p221_p2), %v1750_v5  ;;  %v1974_v32 = vsub.s32 (!%p221_p2), 0, %v1971_v31  ;;  %v1985_v4 = vsub.s32 (!%p221_p2), 1, %v1971_v31  ;;  %vm696_vm15 = vcmask (!%p221_p2), 64512   ;;  %vm850_vm1 = vcmask (!%p221_p2), 257024  }
   0xb   : > { %vm1090_vm3 = vcmask (!%p221_p2), 253952  }
   0xc   : > { %v312_v34 = vrot.slane (!%p221_p2), %v274_v33, %v1974_v32  ;;  %v438_v6 = vrot.slane (!%p221_p2), %v274_v33, %v1985_v4 }
   0xd   : > { %s2236_s22 = smov (!%p252_p3, %s1549_s22), 2  ;;  %1753 = vmatpush3.bf16.msra.mxu0 %v1750_v5  ;;  %v1988_v5 = vsub.s32 2, %v1971_v31 }
   0xe   : > { %s1575_s11 = sshll.u32 %s2236_s22, 4  ;;  %1755 = vmatprep.subr.bf16.mxu0 %v1754_v8  ;;  %s259_s17 = scalar_lea.vmem %s2229_s1, %s2236_s22 }
   0xf   : > { %s256_s14 = scalar_lea.vmem %s2228_s0, %s1575_s11  ;;  %v444_v9 = vrot.slane %v274_v33, %v1988_v5  ;;  %s1556_s18 = sshll.u32 %s2236_s22, 3 }
  0x10   : > { %v264_v10 = vld [vmem:[%s256_s14] sm:$0xff]  ;;  %v265_v11 = vld [vmem:[%s256_s14 + $0x8] sm:$0xff]  ;;  %s1891_s14 = smov 96   ;;  %s2169_s23 = scalar_lea.vmem %s2234_s6, %s1556_s18 }
  0x11   : > { %v279_v13 = vrot.slane %v265_v11, 7  ;;  %290 = vrot.lane.b32.xlu0 %v264_v10, %s1882_s19  ;;  %v278_v14 = vrot.slane %v264_v10, 7  ;;  %v285_v15 = vrot.slane %v264_v10, 1  ;;  %v286_v16 = vrot.slane %v265_v11, 1  ;;  %1757 = vmatpush3.bf16.msra.mxu0 %v1754_v8 }
  0x12   : > { %1760 = vmatprep.subr.msk.bf16.mxu0 %vm1759_vm4, %v1758_v18  ;;  %v1885_v8 = vmov 0.0|0.0  }
  0x13   : > { %v287_v17 = vsel %vm284_vm0, %v285_v15, %v286_v16  ;;  %v280_v19 = vsel %vm277_vm2, %v278_v14, %v279_v13  ;;  %v289_v20 = vsel %vm284_vm0, %v286_v16, 0.0  ;;  %v283_v21 = vsel %vm277_vm2, 0.0, %v278_v14  ;;  %1764 = vmatprep.subr.bf16.mxu1 %v1885_v8 }
  0x14   : > { %297 = vrot.lane.b32.xlu1 %v287_v17, %s1883_s20  ;;  %v1887_v16 = vmov 0.0  }
  0x15   : > { %292 = vrot.lane.b32.xlu0 %v265_v11, %s1882_s19  ;;  %1763 = vmatpush3.bf16.msk.msra.mxu0 %vm1759_vm4, %v1758_v18 }
  0x16   : > { %1653 = vmatprep.mubr.msk.f32.mxu1 %vm1886_vm11, %v1887_v16  ;;  %1671 = vmatprep.subr.mxu0 %v1887_v16 }
  0x18   : > { %299 = vrot.lane.b32.xlu1 %v289_v20, %s1883_s20 }
  0x83   : > { %v291_v22 = vpop.permute.xlu0 %290 }
  0x84   : > { %v304_v23 = vsel %vm303_vm5, %v283_v21, %v291_v22 }
  0x86   : > { %v298_v24 = vpop.permute.xlu1 %297 }
  0x87   : > { %v307_v25 = vsel %vm306_vm6, %v304_v23, %v298_v24  ;;  %v293_v26 = vpop.permute.xlu0 %292 }
  0x88   : > { %1646 = vmatprep.mubr.msk.f32.mxu0 %vm313_vm7, %v307_v25  ;;  %v305_v27 = vsel %vm303_vm5, %v280_v19, %v293_v26 }
  0x8a   : > { %v300_v28 = vpop.permute.xlu1 %299 }
  0x8b   : > { %v308_v29 = vsel %vm306_vm6, %v305_v27, %v300_v28 }
  0x8c   : > { %1647 = vmatmul.mubr.msk.f32.vlgmr.msra.gmra.mrb[0].mxu0 %vm313_vm7, %v308_v29 }
  0x8d   : > { %1673 = vmatprep.mubr.msk.f32.mxu0 %vm1886_vm11, %v1887_v16 }
 0x15f   : > { %v1648_v35 = vpop.f32.mrb[0].mxu0 }
 0x160   : > { %v396_v36 = vadd.f32 %v1648_v35, %v312_v34  ;;  %v390_v37 = vpop.f32.mrb[1].mxu0 }
 0x161   : > { %v391_v38 = vadd.f32 %v390_v37, %v312_v34 }
 0x162   : > { %vm400_vm8 = vcmp.ge.f32.partialorder %v396_v36, 0.0  ;;  %v402_v39 = vmul.f32 0.3, %v396_v36 }
 0x163   : > { %vm399_vm10 = vcmp.ge.f32.partialorder %v391_v38, 0.0  ;;  %v401_v40 = vmul.f32 0.3, %v391_v38 }
 0x164   : > { %v404_v41 = vsel %vm400_vm8, %v396_v36, %v402_v39  ;;  %v447_v39 = vld [vmem:[%s2230_s2 + $0x48] sm:$0xff] }
 0x165   : > { %v407_v42 = vsel %vm405_vm9, %v404_v41, 0.0  ;;  %v403_v43 = vsel %vm399_vm10, %v391_v38, %v401_v40  ;;  %v448_v40 = vld [vmem:[%s2230_s2 + $0x50] sm:$0xff] }
 0x166   : > { %v406_v44 = vsel %vm405_vm9, %v403_v43, 0.0 }
 0x167   : > { %v408_v45 = vadd.f32 %v407_v42, %v406_v44  ;;  %v485_v42 = vld [vmem:[%s2232_s4] sm:$0xff]  ;;  %v449_v44 = vld [vmem:[%s2230_s2 + $0x58] sm:$0xff] }
 0x169   : > { %v409_v46 = vrot.slane %v408_v45, 4 }
 0x16b   : > { %v410_v47 = vadd.f32 %v409_v46, %v408_v45  ;;  %v450_v45 = vld [vmem:[%s2230_s2 + $0x60] sm:$0xff] }
 0x16c   : > { %v1771_v46 = vpack.c.bf16 %v450_v45, %v449_v44 }
 0x16d   : > { %v411_v48 = vrot.slane %v410_v47, 2 }
 0x16f   : > { %v412_v49 = vadd.f32 %v411_v48, %v410_v47  ;;  %v451_v47 = vld [vmem:[%s2230_s2 + $0x68] sm:$0xff]  ;;  %v452_v48 = vld [vmem:[%s2230_s2 + $0x70] sm:$0xff] }
 0x171   : > { %v413_v50 = vrot.slane %v412_v49, 1 }
 0x173   : > { %v414_v51 = vadd.f32 %v413_v50, %v412_v49  ;;  %v1774_v49 = vpack.c.bf16 %v452_v48, %v451_v47  ;;  %v884_v47 = vld [vmem:[%s2231_s3 + $0x8] sm:$0xff] }
 0x175   : > { %v416_v52 = vmul.f32 0.0625, %v414_v51 }
 0x177   : > { %v417_v53 = vsub.f32 %v403_v43, %v416_v52  ;;  %v418_v54 = vsub.f32 %v404_v41, %v416_v52  ;;  %v1768_v43 = vpack.c.bf16 %v448_v40, %v447_v39  ;;  %v453_v52 = vld [vmem:[%s2230_s2 + $0x78] sm:$0x7] }
 0x179   : > { %v419_v55 = vmul.f32 %v417_v53, %v417_v53  ;;  %v420_v56 = vmul.f32 %v418_v54, %v418_v54 }
 0x17b   : > { %v421_v57 = vsel %vm405_vm9, %v419_v55, 0.0  ;;  %v422_v58 = vsel %vm405_vm9, %v420_v56, 0.0 }
 0x17c   : > { %v423_v59 = vadd.f32 %v422_v58, %v421_v57 }
 0x17e   : > { %v424_v60 = vrot.slane %v423_v59, 4 }
 0x180   : > { %v425_v61 = vadd.f32 %v424_v60, %v423_v59 }
 0x182   : > { %v426_v62 = vrot.slane %v425_v61, 2 }
 0x184   : > { %v427_v63 = vadd.f32 %v426_v62, %v425_v61 }
 0x186   : > { %v428_v0 = vrot.slane %v427_v63, 1 }
 0x188   : > { %v429_v1 = vadd.f32 %v428_v0, %v427_v63 }
 0x18a   : > { %v430_v2 = vmul.f32 0.0625, %v429_v1 }
 0x18c   : > { %v431_v3 = vadd.f32 1e-05, %v430_v2 }
 0x18e   : > { %1844 = vrsqrt.f32 %v431_v3 }
 0x198   : > { %v1845_v7 = vpop.eup %1844 }
 0x199   : > { %v433_v10 = vmul.f32 %v1845_v7, %v417_v53  ;;  %v434_v11 = vmul.f32 %v1845_v7, %v418_v54  ;;  %v562_v53 = vrot.slane %v453_v52, %v1974_v32 }
 0x19b   : > { %v439_v12 = vmul.f32 %v438_v6, %v433_v10  ;;  %v440_v13 = vmul.f32 %v438_v6, %v434_v11 }
 0x19d   : > { %v445_v14 = vadd.f32 %v444_v9, %v439_v12  ;;  %v446_v15 = vadd.f32 %v444_v9, %v440_v13 }
 0x19f   : > { %v1834_v17 = vpack.i.bf16 %v446_v15, %v445_v14  ;;  %v462_v18 = vrot.slane %v445_v14, 1  ;;  %v463_v19 = vrot.slane %v446_v15, 1  ;;  %v456_v20 = vrot.slane %v445_v14, 7 }
 0x1a0   : > { %v457_v21 = vrot.slane %v446_v15, 7 }
 0x1a1   : > { %1835 = vrot.lane.b32.xlu0 %v1834_v17, %s1888_s25  ;;  %v464_v22 = vsel %vm284_vm0, %v462_v18, %v463_v19  ;;  %v466_v23 = vsel %vm284_vm0, %v463_v19, 0.0  ;;  %v461_v34 = vsel %vm277_vm2, 0.0, %v456_v20  ;;  %v665_v18 = vrot.slane %v453_v52, %v1985_v4  ;;  %v672_v19 = vld [vmem:[%s2230_s2 + $0x80] sm:$0xff] }
 0x1a2   : > { %v1839_v24 = vpack.i.bf16 %v466_v23, %v464_v22  ;;  %v458_v25 = vsel %vm277_vm2, %v456_v20, %v457_v21  ;;  %v673_v20 = vld [vmem:[%s2230_s2 + $0x88] sm:$0xff]  ;;  %v674_v21 = vld [vmem:[%s2230_s2 + $0x90] sm:$0xff] }
 0x1a3   : > { %v1777_v23 = vpack.c.bf16 %v673_v20, %v672_v19 }
 0x1a4   : > { %1840 = vrot.lane.b32.xlu1 %v1839_v24, %s1889_s26  ;;  %v675_v24 = vld [vmem:[%s2230_s2 + $0x98] sm:$0xff] }
 0x213   : > { %v1836_v26 = vpop.permute.xlu0 %1835 }
 0x214   : > { %v1838_v27 = vunpack.i.h.bf16 %v1836_v26  ;;  %v1837_v28 = vunpack.i.l.bf16 %v1836_v26  ;;  %v670_v26 = vrot.slane %v453_v52, %v1988_v5  ;;  %v887_v52 = vld [vmem:[%s2231_s3 + $0x20] sm:$0xff] }
 0x216   : > { %v1841_v29 = vpop.permute.xlu1 %1840  ;;  %v480_v35 = vsel %vm405_vm9, %v461_v34, %v1837_v28  ;;  %v481_v36 = vsel %vm405_vm9, %v458_v25, %v1838_v27  ;;  %v1780_v27 = vpack.c.bf16 %v675_v24, %v674_v21 }
 0x217   : > { %v1843_v30 = vunpack.i.h.bf16 %v1841_v29  ;;  %v1842_v33 = vunpack.i.l.bf16 %v1841_v29  ;;  %v676_v29 = vld [vmem:[%s2230_s2 + $0xa0] sm:$0xff] }
 0x219   : > { %v483_v37 = vsel %vm482_vm12, %v480_v35, %v1842_v33  ;;  %v484_v38 = vsel %vm482_vm12, %v481_v36, %v1843_v30  ;;  %v677_v30 = vld [vmem:[%s2230_s2 + $0xa8] sm:$0xff] }
 0x21a   : > { %v1765_v41 = vpack.c.bf16 %v484_v38, %v483_v37  ;;  %v1783_v34 = vpack.c.bf16 %v677_v30, %v676_v29  ;;  %v2139_v30 = vld [vmem:[%s2231_s3 + $0x41] sm:$0x1] }
 0x21c   : > { %1766 = vmatpush3.bf16.msra.mxu1 %v1765_v41 }
 0x21d   : > { %1767 = vmatprep.subr.bf16.mxu1 %v1885_v8 }
 0x21f   : > { %1654 = vmatmul.mubr.msk.f32.vlgmr.msra.gmra.mrb[0].mxu1 %vm405_vm9, %v485_v42  ;;  %v695_v42 = vld [vmem:[%s2233_s5] sm:$0xf] }
 0x220   : > { %1769 = vmatpush3.bf16.msra.mxu1 %v1768_v43  ;;  %1668 = vmatprep.mubr.msk.f32.mxu1 %vm1886_vm11, %v1887_v16 }
 0x221   : > { %1770 = vmatprep.subr.bf16.mxu1 %v1885_v8 }
 0x224   : > { %1772 = vmatpush3.bf16.msra.mxu1 %v1771_v46  ;;  %v883_v46 = vld [vmem:[%s2231_s3] sm:$0xff] }
 0x225   : > { %1773 = vmatprep.subr.bf16.mxu1 %v1885_v8  ;;  %v1786_v48 = vpack.c.bf16 %v884_v47, %v883_v46 }
 0x228   : > { %1775 = vmatpush3.bf16.msra.mxu1 %v1774_v49  ;;  %v885_v49 = vld [vmem:[%s2231_s3 + $0x10] sm:$0xff] }
 0x229   : > { %1776 = vmatprep.subr.bf16.mxu1 %v1885_v8 }
 0x2f2   : > { %v555_v50 = vpop.f32.mrb[0].mxu1 }
 0x2f3   : > { %v1655_v51 = vpop.f32.mrb[1].mxu1  ;;  %1669 = vmatmul.mubr.msk.f32.vlgmr.msra.gmra.mrb[2].mxu1 %vm563_vm13, %v555_v50  ;;  %v886_v50 = vld [vmem:[%s2231_s3 + $0x18] sm:$0xff] }
 0x2f4   : > { %1688 = vmatprep.mubr.msk.f32.mxu1 %vm1886_vm11, %v1887_v16  ;;  %1778 = vmatpush3.bf16.msra.mxu1 %v1777_v23  ;;  %v1789_v51 = vpack.c.bf16 %v886_v50, %v885_v49 }
 0x2f5   : > { %1779 = vmatprep.subr.bf16.mxu1 %v1885_v8 }
 0x2f8   : > { %1781 = vmatpush3.bf16.msra.mxu1 %v1780_v27 }
 0x2f9   : > { %1782 = vmatprep.subr.bf16.mxu1 %v1885_v8 }
 0x2fc   : > { %1784 = vmatpush3.bf16.msra.mxu1 %v1783_v34 }
 0x2fd   : > { %1797 = vmatprep.subr.bf16.mxu1 %v1885_v8 }
 0x3c6   : > { %v633_v54 = vpop.f32.mrb[2].mxu1 }
 0x3c7   : > { %v634_v55 = vadd.f32 %v633_v54, %v562_v53  ;;  %v1670_v56 = vpop.f32.mrb[3].mxu1  ;;  %v888_v53 = vld [vmem:[%s2231_s3 + $0x28] sm:$0xff] }
 0x3c8   : > { %v2103_v54 = vpack.c.bf16 %v888_v53, %v887_v52  ;;  %v890_v56 = vld [vmem:[%s2231_s3 + $0x38] sm:$0xff] }
 0x3c9   : > { %vm637_vm14 = vcmp.ge.f32.partialorder %v634_v55, 0.0  ;;  %v638_v57 = vmul.f32 0.3, %v634_v55 }
 0x3cb   : > { %v639_v58 = vsel %vm637_vm14, %v634_v55, %v638_v57  ;;  %v889_v55 = vld [vmem:[%s2231_s3 + $0x30] sm:$0xff] }
 0x3cc   : > { %v640_v59 = vsel %vm405_vm9, %v639_v58, 0.0  ;;  %v2113_v57 = vpack.c.bf16 %v890_v56, %v889_v55 }
 0x3cd   : > { %v641_v60 = vrot.slane %v640_v59, 4 }
 0x3cf   : > { %v642_v61 = vadd.f32 %v641_v60, %v640_v59 }
 0x3d1   : > { %v643_v62 = vrot.slane %v642_v61, 2 }
 0x3d3   : > { %v644_v63 = vadd.f32 %v643_v62, %v642_v61 }
 0x3d5   : > { %v645_v0 = vrot.slane %v644_v63, 1 }
 0x3d7   : > { %v646_v1 = vadd.f32 %v645_v0, %v644_v63 }
 0x3d9   : > { %v648_v2 = vmul.f32 0.125, %v646_v1 }
 0x3db   : > { %v649_v3 = vsub.f32 %v639_v58, %v648_v2  ;;  %v678_v58 = vld [vmem:[%s2230_s2 + $0xb0] sm:$0x7] }
 0x3dc   : > { %v773_v59 = vrot.slane %v678_v58, %v1974_v32  ;;  %v876_v24 = vrot.slane %v678_v58, %v1985_v4  ;;  %v881_v27 = vrot.slane %v678_v58, %v1988_v5 }
 0x3dd   : > { %v650_v6 = vmul.f32 %v649_v3, %v649_v3 }
 0x3df   : > { %v651_v7 = vsel %vm405_vm9, %v650_v6, 0.0 }
 0x3e0   : > { %v652_v9 = vrot.slane %v651_v7, 4 }
 0x3e2   : > { %v653_v10 = vadd.f32 %v652_v9, %v651_v7 }
 0x3e4   : > { %v654_v11 = vrot.slane %v653_v10, 2 }
 0x3e6   : > { %v655_v12 = vadd.f32 %v654_v11, %v653_v10 }
 0x3e8   : > { %v656_v13 = vrot.slane %v655_v12, 1 }
 0x3ea   : > { %v657_v14 = vadd.f32 %v656_v13, %v655_v12 }
 0x3ec   : > { %v658_v15 = vmul.f32 0.125, %v657_v14 }
 0x3ee   : > { %v659_v17 = vadd.f32 1e-05, %v658_v15 }
 0x3f0   : > { %1846 = vrsqrt.f32 %v659_v17 }
 0x3fa   : > { %v1847_v22 = vpop.eup %1846 }
 0x3fb   : > { %v661_v25 = vmul.f32 %v1847_v22, %v649_v3 }
 0x3fd   : > { %v666_v28 = vmul.f32 %v665_v18, %v661_v25 }
 0x3ff   : > { %v671_v33 = vadd.f32 %v670_v26, %v666_v28 }
 0x401   : > { %686 = vrot.lane.b32.xlu0 %v671_v33, %s1888_s25  ;;  %v683_v35 = vrot.slane %v671_v33, 1  ;;  %v680_v37 = vrot.slane %v671_v33, 7 }
 0x403   : > { %v685_v36 = vsel %vm284_vm0, %v683_v35, 0.0  ;;  %v682_v39 = vsel %vm277_vm2, 0.0, %v680_v37 }
 0x404   : > { %690 = vrot.lane.b32.xlu1 %v685_v36, %s1889_s26  ;;  %v1564_v36 = vld [vmem:[%s2231_s3 + $0x40] ss:$0 sm:$0xff] }
 0x473   : > { %v687_v38 = vpop.permute.xlu0 %686 }
 0x474   : > { %v693_v40 = vsel %vm405_vm9, %v682_v39, %v687_v38 }
 0x476   : > { %v691_v41 = vpop.permute.xlu1 %690 }
 0x477   : > { %v694_v43 = vsel %vm482_vm12, %v693_v40, %v691_v41 }
 0x478   : > { %1672 = vmatpush3.msra.mxu0 %v694_v43 }
 0x479   : > { %1674 = vmatmul.mubr.msk.f32.vlgmr.msra.gmra.mrb[2].mxu0 %vm696_vm15, %v695_v42  ;;  %1785 = vmatprep.subr.bf16.mxu0 %v1885_v8 }
 0x47a   : > { %1699 = vmatprep.mubr.msk.f32.mxu0 %vm1886_vm11, %v1887_v16  ;;  %1787 = vmatpush3.bf16.msra.mxu0 %v1786_v48  ;;  %v1892_v48 = vmov 1966171168  }
 0x47b   : > { %1788 = vmatprep.subr.bf16.mxu0 %v1885_v8  ;;  %v1073_v49 = vunpack.c.l.s4 %v1892_v48 }
 0x47d   : > { %v1074_v50 = vunpack.c.0.s8 %v1073_v49 }
 0x47e   : > { %1790 = vmatpush3.bf16.msra.mxu0 %v1789_v51 }
 0x47f   : > { %1791 = vmatprep.subr.bf16.mxu0 %v1885_v8  ;;  %v2153_v53 = vsub.s32 %v1074_v50, %v1971_v31 }
 0x54c   : > { %v766_v44 = vpop.f32.mrb[2].mxu0 }
 0x54d   : > { %1689 = vmatmul.mubr.msk.f32.vlgmr.msra.gmra.mrb[4].mxu1 %vm563_vm13, %v766_v44  ;;  %v1675_v45 = vpop.f32.mrb[3].mxu0 }
 0x54e   : > { %1721 = vmatprep.mubr.msk.f32.mxu1 %vm1886_vm11, %v1887_v16  ;;  %1799 = vmatpush3.bf16.msra.mxu1 %v2103_v54 }
 0x54f   : > { %1800 = vmatprep.subr.bf16.mxu1 %v1885_v8 }
 0x552   : > { %1802 = vmatpush3.bf16.msra.mxu1 %v2113_v57 }
 0x553   : > { %1809 = vmatprep.subr.bf16.mxu1 %v1885_v8 }
 0x620   : > { %v843_v60 = vpop.f32.mrb[4].mxu1 }
 0x621   : > { %v844_v61 = vadd.f32 %v843_v60, %v773_v59  ;;  %v1690_v62 = vpop.f32.mrb[5].mxu1 }
 0x623   : > { %vm847_vm0 = vcmp.ge.f32.partialorder %v844_v61, 0.0  ;;  %v848_v63 = vmul.f32 0.3, %v844_v61 }
 0x625   : > { %v849_v0 = vsel %vm847_vm0, %v844_v61, %v848_v63  ;;  %v2162_v61 = vld [vmem:[%s259_s17] sm:$0x1] }
 0x626   : > { %v851_v1 = vsel %vm850_vm1, %v849_v0, 0.0  ;;  %vm1070_vm2 = vcmp.gt.f32.partialorder %v2162_v61, 0.0  ;;  %vm1200_vm4 = vcmp.gt.f32.partialorder %v2162_v61, 1.0  ;;  %vm1331_vm5 = vcmp.gt.f32.partialorder %v2162_v61, 2.0 }
 0x627   : > { %v852_v2 = vrot.slane %v851_v1, 4  ;;  %vm1462_vm6 = vcmp.gt.f32.partialorder %v2162_v61, 3.0 }
 0x629   : > { %v853_v3 = vadd.f32 %v852_v2, %v851_v1 }
 0x62b   : > { %v854_v6 = vrot.slane %v853_v3, 2 }
 0x62d   : > { %v855_v7 = vadd.f32 %v854_v6, %v853_v3 }
 0x62f   : > { %v856_v9 = vrot.slane %v855_v7, 1 }
 0x631   : > { %v857_v10 = vadd.f32 %v856_v9, %v855_v7 }
 0x633   : > { %v859_v11 = vmul.f32 0.25, %v857_v10 }
 0x635   : > { %v860_v12 = vsub.f32 %v849_v0, %v859_v11 }
 0x637   : > { %v861_v13 = vmul.f32 %v860_v12, %v860_v12 }
 0x639   : > { %v862_v14 = vsel %vm850_vm1, %v861_v13, 0.0 }
 0x63a   : > { %v863_v15 = vrot.slane %v862_v14, 4 }
 0x63c   : > { %v864_v17 = vadd.f32 %v863_v15, %v862_v14 }
 0x63e   : > { %v865_v18 = vrot.slane %v864_v17, 2 }
 0x640   : > { %v866_v19 = vadd.f32 %v865_v18, %v864_v17 }
 0x642   : > { %v867_v20 = vrot.slane %v866_v19, 1 }
 0x644   : > { %v868_v21 = vadd.f32 %v867_v20, %v866_v19 }
 0x646   : > { %v869_v22 = vmul.f32 0.25, %v868_v21 }
 0x648   : > { %v870_v23 = vadd.f32 1e-05, %v869_v22 }
 0x64a   : > { %1848 = vrsqrt.f32 %v870_v23 }
 0x654   : > { %v1849_v25 = vpop.eup %1848 }
 0x655   : > { %v872_v26 = vmul.f32 %v1849_v25, %v860_v12 }
 0x657   : > { %v877_v28 = vmul.f32 %v876_v24, %v872_v26 }
 0x659   : > { %v882_v29 = vadd.f32 %v881_v27, %v877_v28 }
 0x65b   : > { %1700 = vmatmul.mubr.msk.f32.vlgmr.msra.gmra.mrb[4].mxu0 %vm482_vm12, %v882_v29 }
 0x65c   : > { %1793 = vmatpush3.bf16.msra.mxu0 %v2103_v54  ;;  %1710 = vmatprep.mubr.msk.f32.mxu0 %vm1886_vm11, %v1887_v16 }
 0x65d   : > { %1794 = vmatprep.subr.bf16.mxu0 %v1885_v8 }
 0x660   : > { %1796 = vmatpush3.bf16.msra.mxu0 %v2113_v57 }
 0x661   : > { %1803 = vmatprep.subr.bf16.mxu0 %v1885_v8 }
 0x663   : > { %1711 = vmatmul.mubr.f32.vlgmr.msra.gmra.mrb[6].mxu0 %v1887_v16 }
 0x664   : > { %1805 = vmatpush3.bf16.msra.mxu0 %v2103_v54  ;;  %1732 = vmatprep.mubr.msk.f32.mxu0 %vm1886_vm11, %v1887_v16 }
 0x665   : > { %1806 = vmatprep.subr.bf16.mxu0 %v1885_v8 }
 0x668   : > { %1808 = vmatpush3.bf16.msra.mxu0 %v2113_v57 }
 0x72e   : > { %v967_v4 = vpop.f32.mrb[4].mxu0 }
 0x72f   : > { %v1701_v5 = vpop.f32.mrb[5].mxu0  ;;  %v2146_v37 = vadd.f32 %v1564_v36, %v967_v4 }
 0x736   : > { %v1040_v33 = vpop.f32.mrb[6].mxu0 }
 0x737   : > { %v1041_v34 = vadd.f32 %v1040_v33, %v2139_v30  ;;  %v1712_v35 = vpop.f32.mrb[7].mxu0 }
 0x739   : > { %1052 = vrot.lane.b32.xlu0 %v1041_v34, %s1890_s12  ;;  %v1044_v38 = vadd.f32 %v1041_v34, %v2146_v37 }
 0x73b   : > { %v1566_v39 = vmul.f32 -1.442695, %v1044_v38 }
 0x73d   : > { %1850 = vpow2.f32 %v1566_v39 }
 0x747   : > { %v1851_v40 = vpop.eup %1850 }
 0x748   : > { %v1048_v41 = vadd.f32 1.0, %v1851_v40 }
 0x74a   : > { %1852 = vrcp.f32 %v1048_v41 }
 0x754   : > { %v1853_v42 = vpop.eup %1852 }
 0x755   : > { %v1062_v51 = vsub.f32 1.0, %v1853_v42  ;;  %v1068_v55 = vmul.f32 0.0, %v1853_v42 }
 0x7ab   : > { %v1053_v43 = vpop.permute.xlu0 %1052 }
 0x7ac   : > { %v1055_v44 = vmul.f32 %v1853_v42, %v1053_v43 }
 0x7ae   : > { %1057 = vrot.lane.b32.xlu1 %v1055_v44, %s1890_s12 }
 0x820   : > { %v1058_v45 = vpop.permute.xlu1 %1057 }
 0x821   : > { %v1060_v46 = vadd.f32 %v1058_v45, %v2146_v37 }
 0x823   : > { %1854 = vtanh.f32 %v1060_v46 }
 0x82d   : > { %v1855_v47 = vpop.eup %1854 }
 0x82e   : > { %1064 = vrot.lane.b32.xlu0 %v1855_v47, %s1891_s14 }
 0x8a0   : > { %v1065_v52 = vpop.permute.xlu0 %1064 }
 0x8a1   : > { %v1067_v56 = vmul.f32 %v1065_v52, %v1062_v51 }
 0x8a3   : > { %v1069_v58 = vadd.f32 %v1068_v55, %v1067_v56 }
 0x8a5   : > { %v1078_v59 = vrot.slane %v1069_v58, %v2153_v53 }
 0x8a7   : > { %v1085_v60 = vrot.slane %v1078_v59, %v2153_v53 }
 0x8a9   : > { %1086 = vrot.lane.b32.xlu1 %v1085_v60, %s1891_s14 }
 0x91b   : > { %v1087_v31 = vpop.permute.xlu1 %1086 }
 0x91c   : > { %v1089_v62 = vsel %vm1070_vm2, %v1087_v31, 0.0 }
 0x91d   : > { %1091 = vst.msk [vmem:[%s2169_s23] sm:$0x1] %vm1090_vm3, %v1089_v62  ;;  %1722 = vmatmul.mubr.msk.f32.vlgmr.msra.gmra.mrb[6].mxu1 %vm482_vm12, %v1089_v62 }
 0x91e   : > { %1811 = vmatpush3.bf16.msra.mxu1 %v2103_v54  ;;  %1743 = vmatprep.mubr.msk.f32.mxu1 %vm1886_vm11, %v1887_v16 }
 0x91f   : > { %1812 = vmatprep.subr.bf16.mxu1 %v1885_v8  ;;  %v1194_v8 = vrot.slane %v1089_v62, %v1974_v32 }
 0x922   : > { %1814 = vmatpush3.bf16.msra.mxu1 %v2113_v57 }
 0x9f0   : > { %v1161_v63 = vpop.f32.mrb[6].mxu1 }
 0x9f1   : > { %v1162_v0 = vadd.f32 %v1161_v63, %v2139_v30  ;;  %v1723_v1 = vpop.f32.mrb[7].mxu1 }
 0x9f3   : > { %v1166_v2 = vrot.slane %v1162_v0, 7 }
 0x9f5   : > { %1175 = vrot.lane.b32.xlu0 %v1166_v2, %s1890_s12  ;;  %v1168_v3 = vadd.f32 %v1166_v2, %v2146_v37 }
 0x9f7   : > { %v1568_v6 = vmul.f32 -1.442695, %v1168_v3 }
 0x9f9   : > { %1856 = vpow2.f32 %v1568_v6 }
 0xa03   : > { %v1857_v7 = vpop.eup %1856 }
 0xa04   : > { %v1172_v54 = vadd.f32 1.0, %v1857_v7 }
 0xa06   : > { %1858 = vrcp.f32 %v1172_v54 }
 0xa10   : > { %v1859_v9 = vpop.eup %1858 }
 0xa11   : > { %v1185_v14 = vsub.f32 1.0, %v1859_v9 }
 0xa67   : > { %v1176_v16 = vpop.permute.xlu0 %1175 }
 0xa68   : > { %v1178_v10 = vmul.f32 %v1859_v9, %v1176_v16 }
 0xa6a   : > { %1180 = vrot.lane.b32.xlu1 %v1178_v10, %s1890_s12 }
 0xa6e   : > { %1195 = vrot.lane.b32.xlu1 %v1194_v8, %s1889_s26 }
 0xadc   : > { %v1181_v57 = vpop.permute.xlu1 %1180 }
 0xadd   : > { %v1183_v11 = vadd.f32 %v1181_v57, %v2146_v37 }
 0xadf   : > { %1860 = vtanh.f32 %v1183_v11 }
 0xae0   : > { %v1196_v13 = vpop.permute.xlu1 %1195 }
 0xae1   : > { %v1198_v17 = vmul.f32 %v1859_v9, %v1196_v13 }
 0xae9   : > { %v1861_v12 = vpop.eup %1860 }
 0xaea   : > { %1187 = vrot.lane.b32.xlu0 %v1861_v12, %s1891_s14 }
 0xb5c   : > { %v1188_v15 = vpop.permute.xlu0 %1187 }
 0xb5d   : > { %v1190_v18 = vmul.f32 %v1188_v15, %v1185_v14 }
 0xb5f   : > { %v1199_v19 = vadd.f32 %v1198_v17, %v1190_v18 }
 0xb61   : > { %v1208_v20 = vrot.slane %v1199_v19, %v2153_v53 }
 0xb63   : > { %v1209_v21 = vcombine.high %v1208_v20, %v1208_v20 }
 0xb65   : > { %v1216_v22 = vrot.slane %v1209_v21, %v2153_v53 }
 0xb67   : > { %1217 = vrot.lane.b32.xlu0 %v1216_v22, %s1891_s14 }
 0xbd9   : > { %v1218_v23 = vpop.permute.xlu0 %1217 }
 0xbda   : > { %v1220_v24 = vsel %vm1200_vm4, %v1218_v23, %v1089_v62  ;;  %v1221_v25 = vsel %vm1200_vm4, %v1218_v23, 0.0 }
 0xbdb   : > { %1222 = vst.msk [vmem:[%s2169_s23 + $0x1] sm:$0x1] %vm1090_vm3, %v1221_v25  ;;  %1733 = vmatmul.mubr.msk.f32.vlgmr.msra.gmra.mrb[8].mxu0 %vm482_vm12, %v1220_v24  ;;  %v1325_v39 = vrot.slane %v1220_v24, %v1974_v32 }
 0xcae   : > { %v1292_v26 = vpop.f32.mrb[8].mxu0 }
 0xcaf   : > { %v1293_v27 = vadd.f32 %v1292_v26, %v2139_v30  ;;  %v1734_v28 = vpop.f32.mrb[9].mxu0 }
 0xcb1   : > { %v1297_v29 = vrot.slane %v1293_v27, 6 }
 0xcb3   : > { %1306 = vrot.lane.b32.xlu1 %v1297_v29, %s1890_s12  ;;  %v1299_v4 = vadd.f32 %v1297_v29, %v2146_v37 }
 0xcb5   : > { %v1570_v5 = vmul.f32 -1.442695, %v1299_v4 }
 0xcb7   : > { %1862 = vpow2.f32 %v1570_v5 }
 0xcc1   : > { %v1863_v33 = vpop.eup %1862 }
 0xcc2   : > { %v1303_v34 = vadd.f32 1.0, %v1863_v33 }
 0xcc4   : > { %1864 = vrcp.f32 %v1303_v34 }
 0xcce   : > { %v1865_v35 = vpop.eup %1864 }
 0xccf   : > { %v1316_v44 = vsub.f32 1.0, %v1865_v35 }
 0xd25   : > { %v1307_v36 = vpop.permute.xlu1 %1306 }
 0xd26   : > { %v1309_v38 = vmul.f32 %v1865_v35, %v1307_v36 }
 0xd28   : > { %1311 = vrot.lane.b32.xlu0 %v1309_v38, %s1890_s12 }
 0xd2c   : > { %1326 = vrot.lane.b32.xlu0 %v1325_v39, %s1889_s26 }
 0xd9a   : > { %v1312_v40 = vpop.permute.xlu0 %1311 }
 0xd9b   : > { %v1314_v41 = vadd.f32 %v1312_v40, %v2146_v37 }
 0xd9d   : > { %1866 = vtanh.f32 %v1314_v41 }
 0xd9e   : > { %v1327_v43 = vpop.permute.xlu0 %1326 }
 0xd9f   : > { %v1329_v46 = vmul.f32 %v1865_v35, %v1327_v43 }
 0xda7   : > { %v1867_v42 = vpop.eup %1866 }
 0xda8   : > { %1318 = vrot.lane.b32.xlu1 %v1867_v42, %s1891_s14 }
 0xe1a   : > { %v1319_v45 = vpop.permute.xlu1 %1318 }
 0xe1b   : > { %v1321_v47 = vmul.f32 %v1319_v45, %v1316_v44 }
 0xe1d   : > { %v1330_v48 = vadd.f32 %v1329_v46, %v1321_v47 }
 0xe1f   : > { %v1339_v49 = vrot.slane %v1330_v48, %v2153_v53 }
 0xe21   : > { %v1346_v50 = vrot.slane %v1339_v49, %v2153_v53 }
 0xe23   : > { %v1347_v51 = vcombine.high %v1346_v50, %v1346_v50 }
 0xe25   : > { %1348 = vrot.lane.b32.xlu1 %v1347_v51, %s1891_s14 }
 0xe97   : > { %v1349_v52 = vpop.permute.xlu1 %1348 }
 0xe98   : > { %v1351_v55 = vsel %vm1331_vm5, %v1349_v52, %v1220_v24  ;;  %v1352_v56 = vsel %vm1331_vm5, %v1349_v52, 0.0 }
 0xe99   : > { %1353 = vst.msk [vmem:[%s2169_s23 + $0x2] sm:$0x1] %vm1090_vm3, %v1352_v56  ;;  %1744 = vmatmul.mubr.msk.f32.vlgmr.msra.gmra.mrb[8].mxu1 %vm482_vm12, %v1351_v55  ;;  %v1456_v7 = vrot.slane %v1351_v55, %v1974_v32 }
 0xf6c   : > { %v1423_v58 = vpop.f32.mrb[8].mxu1 }
 0xf6d   : > { %v1424_v59 = vadd.f32 %v1423_v58, %v2139_v30  ;;  %v1745_v60 = vpop.f32.mrb[9].mxu1 }
 0xf6f   : > { %v1428_v31 = vrot.slane %v1424_v59, 5 }
 0xf71   : > { %1437 = vrot.lane.b32.xlu0 %v1428_v31, %s1890_s12  ;;  %v1430_v62 = vadd.f32 %v1428_v31, %v2146_v37 }
 0xf73   : > { %v1572_v63 = vmul.f32 -1.442695, %v1430_v62 }
 0xf75   : > { %1868 = vpow2.f32 %v1572_v63 }
 0xf7f   : > { %v1869_v0 = vpop.eup %1868 }
 0xf80   : > { %v1434_v1 = vadd.f32 1.0, %v1869_v0 }
 0xf82   : > { %1870 = vrcp.f32 %v1434_v1 }
 0xf8c   : > { %v1871_v2 = vpop.eup %1870 }
 0xf8d   : > { %v1447_v10 = vsub.f32 1.0, %v1871_v2 }
 0xfe3   : > { %v1438_v3 = vpop.permute.xlu0 %1437 }
 0xfe4   : > { %v1440_v6 = vmul.f32 %v1871_v2, %v1438_v3 }
 0xfe6   : > { %1442 = vrot.lane.b32.xlu1 %v1440_v6, %s1890_s12 }
 0xfea   : > { %1457 = vrot.lane.b32.xlu1 %v1456_v7, %s1889_s26 }
0x1058   : > { %v1443_v30 = vpop.permute.xlu1 %1442 }
0x1059   : > { %v1445_v54 = vadd.f32 %v1443_v30, %v2146_v37 }
0x105b   : > { %1872 = vtanh.f32 %v1445_v54 }
0x105c   : > { %v1458_v16 = vpop.permute.xlu1 %1457 }
0x105d   : > { %v1460_v57 = vmul.f32 %v1871_v2, %v1458_v16 }
0x1065   : > { %v1873_v9 = vpop.eup %1872 }
0x1066   : > { %1449 = vrot.lane.b32.xlu0 %v1873_v9, %s1891_s14 }
0x10d8   : > { %v1450_v8 = vpop.permute.xlu0 %1449 }
0x10d9   : > { %v1452_v11 = vmul.f32 %v1450_v8, %v1447_v10 }
0x10db   : > { %v1461_v12 = vadd.f32 %v1460_v57, %v1452_v11 }
0x10dd   : > { %v1470_v13 = vrot.slane %v1461_v12, %v2153_v53 }
0x10df   : > { %v1471_v32 = vcombine.high %v1470_v13, %v1470_v13 }
0x10e1   : > { %v1478_v14 = vrot.slane %v1471_v32, %v2153_v53 }
0x10e3   : > { %v1479_v15 = vcombine.high %v1478_v14, %v1478_v14 }
0x10e5   : > { %1480 = vrot.lane.b32.xlu0 %v1479_v15, %s1891_s14 }
0x1157   : > { %v1481_v37 = vpop.permute.xlu0 %1480 }
0x1158   : > { %v1483_v17 = vsel %vm1462_vm6, %v1481_v37, %v1351_v55  ;;  %v1484_v18 = vsel %vm1462_vm6, %v1481_v37, 0.0 }
0x1159   : > { %1485 = vst.msk [vmem:[%s2169_s23 + $0x3] sm:$0x1] %vm1090_vm3, %v1484_v18  ;;  %1486 = vst.msk [vmem:[%s2169_s23 + $0x4] sm:$0x1] %vm1090_vm3, %v1483_v17 }
0x115a PF: > { %s16_s21 = sadd.s32 1, %s1880_s21  }
0x115b   : > { %p13_p4 = scmp.ge.s32.totalorder %s16_s21, 5  }
0x115d   :  { %15 = sbr.rel (!%p13_p4) target bundleno = 1 (0x1), region = 77 }

</bundles_post_ra>
